<compile_context>
chip_gen: v6e
topology: v6e:2x2x1
jax: 0.10.0
libtpu: 0.0.40
codegen_flags: <defaults>
</compile_context>

<pallas_src>
import jax
import jax.numpy as jnp
from jax.experimental import pallas as pl
from jax.experimental.pallas import tpu as pltpu


def _mor_kernel(x_ref, wg_ref, bg_ref, w1_ref, b1_ref, w2_ref, eid_ref, out_ref):
    x = x_ref[...]                                              # (TM, Din) f32

    # ---- gating: top-2 over logits (== renormalized top-2 of softmax) ----
    # Kept in f32 and separate from W1 so expert *selection* exactly matches
    # the f32 reference (bf16 gate fusion was flagged "optional" in review).
    logits = jnp.dot(x, wg_ref[...],
                     preferred_element_type=jnp.float32) + bg_ref[...]   # (TM, E)
    n_exp = logits.shape[-1]
    iota_e = jax.lax.broadcasted_iota(jnp.int32, logits.shape, 1)
    m1 = jnp.max(logits, axis=-1, keepdims=True)
    i1 = jnp.min(jnp.where(logits == m1, iota_e, n_exp), axis=-1, keepdims=True)
    masked = jnp.where(iota_e == i1, -jnp.inf, logits)
    m2 = jnp.max(masked, axis=-1, keepdims=True)
    i2 = jnp.min(jnp.where(masked == m2, iota_e, n_exp), axis=-1, keepdims=True)
    g1 = 1.0 / (1.0 + jnp.exp(m2 - m1))                         # (TM, 1)
    g2 = 1.0 - g1

    # ---- fused experts: one matmul up, gate-scale, one matmul down ----
    x_bf = x.astype(jnp.bfloat16)                               # expert-input rounding
    h = jnp.dot(x_bf, w1_ref[...],
                preferred_element_type=jnp.float32) + b1_ref[...]        # (TM, E*(H+1))
    h = jnp.maximum(h, 0.0)                                     # ReLU; bias col -> 1.0

    # scale each expert's (H+1)-wide slice by its gate weight; non-selected
    # experts get an exact 0 (dense equivalent of torch's masked gather)
    eid = eid_ref[...]                                          # (1, E*(H+1)) i32
    w_rep = jnp.where(eid == i1, g1, jnp.where(eid == i2, g2, 0.0))
    h = h * w_rep

    # bias-feature column now holds the gate weight; it multiplies the b2_e
    # row stacked inside w2_ref, so the gate-weighted bias rides along here.
    out_ref[...] = jnp.dot(h.astype(jnp.bfloat16), w2_ref[...],
                           preferred_element_type=jnp.float32)  # (TM, Dout)


def mixture_of_ranks(x, params, *, block_m=None):
    """x: (N, Din) f32. params = (wg[Din,E], bg[1,E], U1[E,Din,R], V1[E,R,H],
    b1[E,H], U2[E,H,R], V2[E,R,Dout], b2[E,Dout]) in f32 (fp16-rounded values)."""
    wg, bg, u1, v1, b1, u2, v2, b2 = params
    n, din = x.shape
    e = u1.shape[0]
    hid = v1.shape[-1]
    dout = v2.shape[-1]
    if block_m is None:
        block_m = n          # single grid step: best on single-TC v5e/v6e
    assert n % block_m == 0 and block_m % 16 == 0, "block_m must divide N, %16==0"

    bf = jnp.bfloat16
    hp1 = hid + 1            # per-expert block: H expert features + 1 bias feature

    # --- collapse each expert's low-rank pair into dense, lane-stacked mats ---
    w1_e = jnp.einsum('eir,erh->eih', u1, v1)                    # (E, Din, H)
    w1_e = jnp.pad(w1_e, ((0, 0), (0, 0), (0, 1)))               # zero bias-feature col
    w1_all = jnp.transpose(w1_e, (1, 0, 2)).reshape(din, e * hp1).astype(bf)
    b1_aug = jnp.pad(b1, ((0, 0), (0, 1)), constant_values=1.0)  # bias col -> 1.0
    b1f = b1_aug.reshape(1, e * hp1).astype(jnp.float32)

    w2_e = jnp.einsum('ehr,erd->ehd', u2, v2)                    # (E, H, Dout)
    w2_e = jnp.concatenate([w2_e, b2[:, None, :]], axis=1)       # stack b2_e row
    w2_all = w2_e.reshape(e * hp1, dout).astype(bf)              # (E*(H+1), Dout)

    eid_row = jnp.repeat(jnp.arange(e, dtype=jnp.int32), hp1)[None, :]  # (1, E*(H+1))

    wgf = wg.astype(jnp.float32)
    bgf = bg.astype(jnp.float32)

    def full(a):
        nd = a.ndim
        return pl.BlockSpec(a.shape, lambda i, _nd=nd: (0,) * _nd)

    flops = 2 * n * (din * e                      # gate
                     + din * (e * hp1)            # x @ W1_all
                     + (e * hp1) * dout)          # @ W2_all (bias folded in)
    bytes_accessed = int((x.size + n * dout) * 4
                         + sum(a.size * a.dtype.itemsize
                               for a in (wgf, bgf, w1_all, b1f, w2_all, eid_row)))
    cost = pl.CostEstimate(flops=flops, transcendentals=n,
                           bytes_accessed=bytes_accessed)

    return pl.pallas_call(
        _mor_kernel,
        out_shape=jax.ShapeDtypeStruct((n, dout), jnp.float32),
        grid=(n // block_m,),
        in_specs=[
            pl.BlockSpec((block_m, din), lambda i: (i, 0)),      # x (token stream)
            full(wgf), full(bgf),
            full(w1_all), full(b1f), full(w2_all), full(eid_row),
        ],
        out_specs=pl.BlockSpec((block_m, dout), lambda i: (i, 0)),
        compiler_params=pltpu.CompilerParams(dimension_semantics=("parallel",)),
        cost_estimate=cost,
    )(x, wgf, bgf, w1_all, b1f, w2_all, eid_row)


def mor_reference(x, params):
    """Pure-JAX reference mirroring the torch forward (dense top-2 mixture),
    evaluated in the kernel's precision regime (pre-fused per-expert weights,
    bf16 matmul operands, f32 accumulation, f32 gating)."""
    wg, bg, u1, v1, b1, u2, v2, b2 = params
    logits = x @ wg + bg[0]
    probs = jax.nn.softmax(logits, axis=-1)
    top2_vals, top2_idx = jax.lax.top_k(probs, 2)
    top2_vals = top2_vals / top2_vals.sum(-1, keepdims=True)
    n, num_experts = probs.shape
    w = jnp.zeros_like(probs).at[jnp.arange(n)[:, None], top2_idx].set(top2_vals)

    xb = x.astype(jnp.bfloat16)
    out = jnp.zeros((n, v2.shape[-1]), jnp.float32)
    for i in range(num_experts):
        w1i = (u1[i] @ v1[i]).astype(jnp.bfloat16)
        w2i = (u2[i] @ v2[i]).astype(jnp.bfloat16)
        hh = jnp.dot(xb, w1i, preferred_element_type=jnp.float32) + b1[i]
        hh = jnp.maximum(hh, 0.0)
        wi = w[:, i:i + 1]
        o = jnp.dot((hh * wi).astype(jnp.bfloat16), w2i,
                    preferred_element_type=jnp.float32) + wi * b2[i]
        out = out + o
    return out


if __name__ == "__main__":
    # output_size must equal input_size (torch uses zeros_like(x) as output).
    E, DIN, DOUT, H, R = 4, 32, 32, 64, 8
    N = 128

    key = jax.random.PRNGKey(0)
    ks = jax.random.split(key, 8)

    # Expert params: torch.randn(...)/sqrt(fan_in) in float16.
    u1 = (jax.random.normal(ks[0], (E, DIN, R)) / DIN ** 0.5).astype(jnp.float16)
    v1 = (jax.random.normal(ks[1], (E, R, H)) / R ** 0.5).astype(jnp.float16)
    b1 = jnp.zeros((E, H), jnp.float16)
    u2 = (jax.random.normal(ks[2], (E, H, R)) / H ** 0.5).astype(jnp.float16)
    v2 = (jax.random.normal(ks[3], (E, R, DOUT)) / R ** 0.5).astype(jnp.float16)
    b2 = jnp.zeros((E, DOUT), jnp.float16)

    # Gate: nn.Linear default init (uniform +/- 1/sqrt(fan_in)), float32.
    # wg is stored transposed vs torch ([Din, E] instead of [E, Din]).
    bound = 1.0 / DIN ** 0.5
    wg = jax.random.uniform(ks[4], (DIN, E), jnp.float32, -bound, bound)
    bg = jax.random.uniform(ks[5], (1, E), jnp.float32, -bound, bound)

    # Params carry their fp16-rounded values in f32; the wrapper pre-fuses the
    # expert weights and re-packs them to bf16 for the MXU.
    params = tuple(p.astype(jnp.float32) for p in (wg, bg, u1, v1, b1, u2, v2, b2))

    x = jax.random.normal(ks[6], (N, DIN), jnp.float32)

    # Default block_m=N -> single grid step (best on single-TC v5e/v6e).
    # On v7x, benchmark block_m=N//2 (grid=(2,), "parallel") against this.
    out = mixture_of_ranks(x, params)
    out = jax.block_until_ready(out)

    ref = mor_reference(x, params)
    assert out.shape == (N, DOUT) and out.dtype == jnp.float32
    max_err = float(jnp.abs(out - ref).max())
    assert jnp.allclose(out, ref, atol=2e-2, rtol=2e-2), max_err

    print("KERNEL_OK")
</pallas_src>

<mosaic_0001>
module attributes {stable_mosaic.version = 11 : i64} {
  func.func @_mor_kernel(%arg0: i32, %arg1: memref<128x32xf32, #tpu.memory_space<vmem>>, %arg2: memref<32x4xf32, #tpu.memory_space<vmem>>, %arg3: memref<1x4xf32, #tpu.memory_space<vmem>>, %arg4: memref<32x260xbf16, #tpu.memory_space<vmem>>, %arg5: memref<1x260xf32, #tpu.memory_space<vmem>>, %arg6: memref<260x32xbf16, #tpu.memory_space<vmem>>, %arg7: memref<1x260xi32, #tpu.memory_space<vmem>>, %arg8: memref<128x32xf32, #tpu.memory_space<vmem>>) attributes {dimension_semantics = [#tpu.dimension_semantics<parallel>], iteration_bounds = array<i64: 1>, scalar_prefetch = 0 : i64, scratch_operands = 0 : i64, tpu.core_type = #tpu.core_type<tc>, window_params = [{transform_indices = @transform_0, window_bounds = array<i64: 128, 32>}, {pipeline_mode = #tpu.pipeline_mode<synchronous>, transform_indices = @transform_1, window_bounds = array<i64: 32, 4>}, {pipeline_mode = #tpu.pipeline_mode<synchronous>, transform_indices = @transform_2, window_bounds = array<i64: 1, 4>}, {pipeline_mode = #tpu.pipeline_mode<synchronous>, transform_indices = @transform_3, window_bounds = array<i64: 32, 260>}, {pipeline_mode = #tpu.pipeline_mode<synchronous>, transform_indices = @transform_4, window_bounds = array<i64: 1, 260>}, {pipeline_mode = #tpu.pipeline_mode<synchronous>, transform_indices = @transform_5, window_bounds = array<i64: 260, 32>}, {pipeline_mode = #tpu.pipeline_mode<synchronous>, transform_indices = @transform_6, window_bounds = array<i64: 1, 260>}, {transform_indices = @transform_7, window_bounds = array<i64: 128, 32>}]} {
    %c0 = arith.constant 0 : index
    %c0_0 = arith.constant 0 : index
    %0 = vector.load %arg1[%c0, %c0_0] : memref<128x32xf32, #tpu.memory_space<vmem>>, vector<128x32xf32>
    %c0_1 = arith.constant 0 : index
    %c0_2 = arith.constant 0 : index
    %1 = vector.load %arg2[%c0_1, %c0_2] : memref<32x4xf32, #tpu.memory_space<vmem>>, vector<32x4xf32>
    %cst = arith.constant dense<0.000000e+00> : vector<128x4xf32>
    %2 = tpu.matmul %0, %1, %cst {dimension_numbers = #tpu.dot_dimension_numbers<[1], [0], [0], [1], [0, 0, 1, 1], [], []>} : vector<128x32xf32>, vector<32x4xf32>, vector<128x4xf32> -> vector<128x4xf32>
    %c0_3 = arith.constant 0 : index
    %c0_4 = arith.constant 0 : index
    %3 = vector.load %arg3[%c0_3, %c0_4] : memref<1x4xf32, #tpu.memory_space<vmem>>, vector<1x4xf32>
    %4 = vector.broadcast %3 : vector<1x4xf32> to vector<128x4xf32>
    %5 = arith.addf %2, %4 : vector<128x4xf32>
    %6 = tpu.iota {dimensions = array<i32: 1>} : vector<128x4xi32>
    %cst_5 = arith.constant dense<0xFF800000> : vector<128xf32>
    %7 = vector.multi_reduction <maximumf>, %5, %cst_5 [1] : vector<128x4xf32> to vector<128xf32>
    %8 = vector.shape_cast %7 : vector<128xf32> to vector<128x1xf32>
    %9 = vector.broadcast %8 : vector<128x1xf32> to vector<128x4xf32>
    %10 = arith.cmpf oeq, %5, %9 : vector<128x4xf32>
    %c4_i32 = arith.constant 4 : i32
    %11 = vector.broadcast %c4_i32 : i32 to vector<128x4xi32>
    %12 = arith.select %10, %6, %11 : vector<128x4xi1>, vector<128x4xi32>
    %cst_6 = arith.constant dense<2147483647> : vector<128xi32>
    %13 = vector.multi_reduction <minsi>, %12, %cst_6 [1] : vector<128x4xi32> to vector<128xi32>
    %14 = vector.shape_cast %13 : vector<128xi32> to vector<128x1xi32>
    %15 = vector.broadcast %14 : vector<128x1xi32> to vector<128x4xi32>
    %16 = arith.cmpi eq, %6, %15 : vector<128x4xi32>
    %cst_7 = arith.constant 0xFF800000 : f32
    %17 = vector.broadcast %cst_7 : f32 to vector<128x4xf32>
    %18 = arith.select %16, %17, %5 : vector<128x4xi1>, vector<128x4xf32>
    %cst_8 = arith.constant dense<0xFF800000> : vector<128xf32>
    %19 = vector.multi_reduction <maximumf>, %18, %cst_8 [1] : vector<128x4xf32> to vector<128xf32>
    %20 = vector.shape_cast %19 : vector<128xf32> to vector<128x1xf32>
    %21 = vector.broadcast %20 : vector<128x1xf32> to vector<128x4xf32>
    %22 = arith.cmpf oeq, %18, %21 : vector<128x4xf32>
    %c4_i32_9 = arith.constant 4 : i32
    %23 = vector.broadcast %c4_i32_9 : i32 to vector<128x4xi32>
    %24 = arith.select %22, %6, %23 : vector<128x4xi1>, vector<128x4xi32>
    %cst_10 = arith.constant dense<2147483647> : vector<128xi32>
    %25 = vector.multi_reduction <minsi>, %24, %cst_10 [1] : vector<128x4xi32> to vector<128xi32>
    %26 = vector.shape_cast %25 : vector<128xi32> to vector<128x1xi32>
    %27 = arith.subf %20, %8 : vector<128x1xf32>
    %28 = math.exp %27 : vector<128x1xf32>
    %cst_11 = arith.constant 1.000000e+00 : f32
    %29 = vector.broadcast %cst_11 : f32 to vector<128x1xf32>
    %30 = arith.addf %29, %28 : vector<128x1xf32>
    %cst_12 = arith.constant 1.000000e+00 : f32
    %31 = vector.broadcast %cst_12 : f32 to vector<128x1xf32>
    %32 = arith.divf %31, %30 : vector<128x1xf32>
    %cst_13 = arith.constant 1.000000e+00 : f32
    %33 = vector.broadcast %cst_13 : f32 to vector<128x1xf32>
    %34 = arith.subf %33, %32 : vector<128x1xf32>
    %35 = arith.truncf %0 : vector<128x32xf32> to vector<128x32xbf16>
    %c0_14 = arith.constant 0 : index
    %c0_15 = arith.constant 0 : index
    %36 = vector.load %arg4[%c0_14, %c0_15] : memref<32x260xbf16, #tpu.memory_space<vmem>>, vector<32x260xbf16>
    %cst_16 = arith.constant dense<0.000000e+00> : vector<128x260xf32>
    %37 = tpu.matmul %35, %36, %cst_16 {dimension_numbers = #tpu.dot_dimension_numbers<[1], [0], [0], [1], [0, 0, 1, 1], [], []>} : vector<128x32xbf16>, vector<32x260xbf16>, vector<128x260xf32> -> vector<128x260xf32>
    %c0_17 = arith.constant 0 : index
    %c0_18 = arith.constant 0 : index
    %38 = vector.load %arg5[%c0_17, %c0_18] : memref<1x260xf32, #tpu.memory_space<vmem>>, vector<1x260xf32>
    %39 = vector.broadcast %38 : vector<1x260xf32> to vector<128x260xf32>
    %40 = arith.addf %37, %39 : vector<128x260xf32>
    %cst_19 = arith.constant 0.000000e+00 : f32
    %41 = vector.broadcast %cst_19 : f32 to vector<128x260xf32>
    %42 = arith.maximumf %40, %41 : vector<128x260xf32>
    %c0_20 = arith.constant 0 : index
    %c0_21 = arith.constant 0 : index
    %43 = vector.load %arg7[%c0_20, %c0_21] : memref<1x260xi32, #tpu.memory_space<vmem>>, vector<1x260xi32>
    %44 = vector.broadcast %43 : vector<1x260xi32> to vector<128x260xi32>
    %45 = vector.broadcast %14 : vector<128x1xi32> to vector<128x260xi32>
    %46 = arith.cmpi eq, %44, %45 : vector<128x260xi32>
    %47 = vector.broadcast %43 : vector<1x260xi32> to vector<128x260xi32>
    %48 = vector.broadcast %26 : vector<128x1xi32> to vector<128x260xi32>
    %49 = arith.cmpi eq, %47, %48 : vector<128x260xi32>
    %cst_22 = arith.constant 0.000000e+00 : f32
    %50 = vector.shape_cast %34 : vector<128x1xf32> to vector<128x1xf32>
    %51 = vector.broadcast %50 : vector<128x1xf32> to vector<128x260xf32>
    %52 = vector.broadcast %cst_22 : f32 to vector<128x260xf32>
    %53 = arith.select %49, %51, %52 : vector<128x260xi1>, vector<128x260xf32>
    %54 = vector.shape_cast %32 : vector<128x1xf32> to vector<128x1xf32>
    %55 = vector.broadcast %54 : vector<128x1xf32> to vector<128x260xf32>
    %56 = arith.select %46, %55, %53 : vector<128x260xi1>, vector<128x260xf32>
    %57 = arith.mulf %42, %56 : vector<128x260xf32>
    %58 = arith.truncf %57 : vector<128x260xf32> to vector<128x260xbf16>
    %c0_23 = arith.constant 0 : index
    %c0_24 = arith.constant 0 : index
    %59 = vector.load %arg6[%c0_23, %c0_24] : memref<260x32xbf16, #tpu.memory_space<vmem>>, vector<260x32xbf16>
    %cst_25 = arith.constant dense<0.000000e+00> : vector<128x32xf32>
    %60 = tpu.matmul %58, %59, %cst_25 {dimension_numbers = #tpu.dot_dimension_numbers<[1], [0], [0], [1], [0, 0, 1, 1], [], []>} : vector<128x260xbf16>, vector<260x32xbf16>, vector<128x32xf32> -> vector<128x32xf32>
    %c0_26 = arith.constant 0 : index
    %c0_27 = arith.constant 0 : index
    %61 = vector.load %arg8[%c0_26, %c0_27] : memref<128x32xf32, #tpu.memory_space<vmem>>, vector<128x32xf32>
    tpu.vector_store %arg8[%c0_26, %c0_27], %60 {strides = array<i32>} : memref<128x32xf32, #tpu.memory_space<vmem>>, vector<128x32xf32>,
    return
  }
  func.func @transform_0(%arg0: i32) -> (i32, i32) {
    %c0_i32 = arith.constant 0 : i32
    %c0_i32_0 = arith.constant 0 : i32
    return %arg0, %c0_i32 : i32, i32
  }
  func.func @transform_1(%arg0: i32) -> (i32, i32) {
    %c0_i32 = arith.constant 0 : i32
    %c0_i32_0 = arith.constant 0 : i32
    %c0_i32_1 = arith.constant 0 : i32
    return %c0_i32, %c0_i32_0 : i32, i32
  }
  func.func @transform_2(%arg0: i32) -> (i32, i32) {
    %c0_i32 = arith.constant 0 : i32
    %c0_i32_0 = arith.constant 0 : i32
    %c0_i32_1 = arith.constant 0 : i32
    return %c0_i32, %c0_i32_0 : i32, i32
  }
  func.func @transform_3(%arg0: i32) -> (i32, i32) {
    %c0_i32 = arith.constant 0 : i32
    %c0_i32_0 = arith.constant 0 : i32
    %c0_i32_1 = arith.constant 0 : i32
    return %c0_i32, %c0_i32_0 : i32, i32
  }
  func.func @transform_4(%arg0: i32) -> (i32, i32) {
    %c0_i32 = arith.constant 0 : i32
    %c0_i32_0 = arith.constant 0 : i32
    %c0_i32_1 = arith.constant 0 : i32
    return %c0_i32, %c0_i32_0 : i32, i32
  }
  func.func @transform_5(%arg0: i32) -> (i32, i32) {
    %c0_i32 = arith.constant 0 : i32
    %c0_i32_0 = arith.constant 0 : i32
    %c0_i32_1 = arith.constant 0 : i32
    return %c0_i32, %c0_i32_0 : i32, i32
  }
  func.func @transform_6(%arg0: i32) -> (i32, i32) {
    %c0_i32 = arith.constant 0 : i32
    %c0_i32_0 = arith.constant 0 : i32
    %c0_i32_1 = arith.constant 0 : i32
    return %c0_i32, %c0_i32_0 : i32, i32
  }
  func.func @transform_7(%arg0: i32) -> (i32, i32) {
    %c0_i32 = arith.constant 0 : i32
    %c0_i32_0 = arith.constant 0 : i32
    return %arg0, %c0_i32 : i32, i32
  }
}

</mosaic_0001>

<bundles_post_ra>
// kernel: tpu_custom_call.1
= control target key start
LH: loop header
LB: loop body
LE: loop exit
PB: predicated region body
PF: predicated region fallthrough
CT: control target
= control target key end

     0   :  { %vm4682_vm0 = vcmask 261120   ;;  %vm250_vm1 = vcmask 31744   ;;  %s4551_s1 = inlined_call_operand.vmem [shape: f32[32,4], index: 1, kind: input, shape index: {}]   ;;  %s4552_s0 = inlined_call_operand.vmem [shape: f32[128,32], index: 0, kind: input, shape index: {}]   ;;  %s4553_s2 = inlined_call_operand.vmem [shape: f32[1,4], index: 2, kind: input, shape index: {}]   ;;  %s4554_s3 = inlined_call_operand.vmem [shape: bf16[32,260], index: 3, kind: input, shape index: {}]   ;;  %s4555_s5 = inlined_call_operand.vmem [shape: bf16[260,32], index: 5, kind: input, shape index: {}]   ;;  %s4556_s6 = inlined_call_operand.vmem [shape: s32[1,260], index: 6, kind: input, shape index: {}]   ;;  %s4557_s4 = inlined_call_operand.vmem [shape: f32[1,260], index: 4, kind: input, shape index: {}]   ;;  %s4558_s7 = inlined_call_operand.vmem [shape: f32[128,32], index: 7, kind: output, shape index: {}]  }
   0x1   :  { %v46_v0 = vld [vmem:[%s4551_s1 + $0x18] sm:$0xff]  ;;  %v45_v1 = vld [vmem:[%s4551_s1 + $0x10] sm:$0xff]  ;;  %v44_v2 = vld [vmem:[%s4551_s1 + $0x8] sm:$0xff] }
   0x2   :  { %2200 = vmatprep.subr.mxu0 %v46_v0  ;;  %v27_v3 = vld [vmem:[%s4552_s0] sm:$0xff]  ;;  %2270 = vmatprep.subr.mxu1 %v46_v0  ;;  %v29_v5 = vld [vmem:[%s4552_s0 + $0x10] sm:$0xff]  ;;  %v30_v6 = vld [vmem:[%s4552_s0 + $0x18] sm:$0xff] }
   0x3   :  { %2201 = vmatpush3.msra.mxu0 %v46_v0  ;;  %v43_v4 = vld [vmem:[%s4551_s1] sm:$0xff]  ;;  %2208 = vmatprep.mubr.msk.f32.mxu0 %vm4682_vm0, %v27_v3  ;;  %v2435_v8 = vpack.c.bf16 %v30_v6, %v29_v5  ;;  %v32_v9 = vld [vmem:[%s4552_s0 + $0x28] sm:$0xff]  ;;  %v33_v10 = vld [vmem:[%s4552_s0 + $0x30] sm:$0xff] }
   0x4   :  { %v31_v7 = vld [vmem:[%s4552_s0 + $0x20] sm:$0xff]  ;;  %2202 = vmatprep.subr.mxu0 %v45_v1  ;;  %2274 = vmatpush3.msra.mxu1 %v46_v0  ;;  %v34_v11 = vld [vmem:[%s4552_s0 + $0x38] sm:$0xff]  ;;  %v36_v15 = vld [vmem:[%s4552_s0 + $0x48] sm:$0xff] }
   0x5   :  { %2203 = vmatpush3.msra.mxu0 %v45_v1  ;;  %v2446_v12 = vpack.c.bf16 %v32_v9, %v31_v7  ;;  %2271 = vmatprep.subr.mxu1 %v45_v1  ;;  %v2448_v13 = vpack.c.bf16 %v34_v11, %v33_v10  ;;  %v35_v14 = vld [vmem:[%s4552_s0 + $0x40] sm:$0xff]  ;;  %v37_v16 = vld [vmem:[%s4552_s0 + $0x50] sm:$0xff]  ;;  %v38_v18 = vld [vmem:[%s4552_s0 + $0x58] sm:$0xff] }
   0x6   :  { %2204 = vmatprep.subr.mxu0 %v44_v2  ;;  %2275 = vmatpush3.msra.mxu1 %v45_v1  ;;  %v2459_v17 = vpack.c.bf16 %v36_v15, %v35_v14  ;;  %v39_v19 = vld [vmem:[%s4552_s0 + $0x60] sm:$0xff]  ;;  %v40_v20 = vld [vmem:[%s4552_s0 + $0x68] sm:$0xff]  ;;  %v2473_v22 = vpack.c.bf16 %v38_v18, %v37_v16  ;;  %v41_v24 = vld [vmem:[%s4552_s0 + $0x70] sm:$0xff] }
   0x7   :  { %2205 = vmatpush3.msra.mxu0 %v44_v2  ;;  %v28_v21 = vld [vmem:[%s4552_s0 + $0x8] sm:$0xff]  ;;  %2272 = vmatprep.subr.mxu1 %v44_v2  ;;  %v2475_v23 = vpack.c.bf16 %v40_v20, %v39_v19  ;;  %v42_v25 = vld [vmem:[%s4552_s0 + $0x78] sm:$0xff]  ;;  %v2033_v29 = vld [vmem:[%s4553_s2] ss:$0 sm:$0xff] }
   0x8   :  { %4683 = vst [vmem:[#allocation2_spill] sm:$0xff] %v2459_v17  ;;  %4684 = vst [vmem:[#allocation3_spill] sm:$0xff] %v2473_v22  ;;  %2206 = vmatprep.subr.mxu0 %v43_v4  ;;  %2276 = vmatpush3.msra.mxu1 %v44_v2  ;;  %v2483_v26 = vpack.c.bf16 %v42_v25, %v41_v24  ;;  %v2497_v27 = vpack.c.bf16 %v28_v21, %v27_v3 }
   0x9   :  { %4685 = vst [vmem:[#allocation4_spill] sm:$0xff] %v2475_v23  ;;  %2207 = vmatpush3.msra.mxu0 %v43_v4  ;;  %2273 = vmatprep.subr.mxu1 %v43_v4 }
   0xa   :  { %4686 = vst [vmem:[#allocation5_spill] sm:$0xff] %v2483_v26  ;;  %2209 = vmatmul.mubr.msk.f32.vlgmr.msra.gmra.mxu0 %vm4682_vm0, %v28_v21  ;;  %2277 = vmatpush3.msra.mxu1 %v43_v4 }
   0xb   :  { %2211 = vmatprep.mubr.msk.f32.mxu0 %vm4682_vm0, %v29_v5  ;;  %2220 = vmatprep.mubr.msk.f32.mxu1 %vm4682_vm0, %v35_v14 }
   0xc   :  { %2221 = vmatmul.mubr.msk.f32.vlgmr.msra.gmra.mxu1 %vm4682_vm0, %v36_v15 }
   0xd   :  { %2223 = vmatprep.mubr.msk.f32.mxu1 %vm4682_vm0, %v37_v16  ;;  %v4559_v16 = vlaneseq }
   0xe   :  { %2212 = vmatmul.mubr.msk.f32.gmra.mxu0 %vm4682_vm0, %v30_v6 }
   0xf   :  { %2214 = vmatprep.mubr.msk.f32.mxu0 %vm4682_vm0, %v31_v7 }
  0x10   :  { %2224 = vmatmul.mubr.msk.f32.gmra.mxu1 %vm4682_vm0, %v38_v18  ;;  %v2572_v18 = vand.u32 127, %v4559_v16 }
  0x11   :  { %2226 = vmatprep.mubr.msk.f32.mxu1 %vm4682_vm0, %v39_v19 }
  0x12   :  { %2215 = vmatmul.mubr.msk.f32.gmra.mxu0 %vm4682_vm0, %v32_v9 }
  0x13   :  { %2217 = vmatprep.mubr.msk.f32.mxu0 %vm4682_vm0, %v33_v10 }
  0x14   :  { %2227 = vmatmul.mubr.msk.f32.gmra.mxu1 %vm4682_vm0, %v40_v20 }
  0x15   :  { %2229 = vmatprep.mubr.msk.f32.mxu1 %vm4682_vm0, %v41_v24 }
  0x16   :  { %2218 = vmatmul.mubr.msk.f32.gmra.mxu0 %vm4682_vm0, %v34_v11 }
  0x17   :  { %2236 = vmatprep.mubr.msk.bf16.mxu0 %vm4682_vm0, %v2497_v27 }
  0x18   :  { %2230 = vmatmul.mubr.msk.f32.gmra.mxu1 %vm4682_vm0, %v42_v25 }
  0xca   :  { %v2210_v28 = vpop.f32.mrf.mxu0 }
  0xcb   :  { %v2509_v35 = vadd.f32 %v2210_v28, %v2033_v29 }
  0xcc   :  { %v169_v30 = vpop.f32.mrf.mxu0  ;;  %v2222_v31 = vpop.f32.mrf.mxu1 }
  0xcd   :  { %v2507_v32 = vadd.f32 %v2033_v29, %v169_v30  ;;  %v254_v44 = vsel %vm250_vm1, %v2509_v35, -inf  ;;  %v2539_v59 = vadd.f32 %v2222_v31, %v2033_v29 }
  0xce   :  { %v2213_v33 = vpop.f32.mrf.mxu0  ;;  %v209_v34 = vpop.f32.mrf.mxu1 }
  0xcf   :  { %v251_v36 = vsel %vm250_vm1, %v2507_v32, -inf  ;;  %v2515_v42 = vadd.f32 %v2213_v33, %v2033_v29  ;;  %v2533_v55 = vadd.f32 %v2033_v29, %v209_v34  ;;  %v278_v2 = vsel %vm250_vm1, %v2539_v59, -inf }
  0xd0   :  { %v179_v37 = vpop.f32.mrf.mxu0  ;;  %252 = vmax.xlane.f32.xlu0 %v251_v36  ;;  %v2225_v38 = vpop.f32.mrf.mxu1 }
  0xd1   :  { %v2513_v39 = vadd.f32 %v2033_v29, %v179_v37  ;;  %v260_v50 = vsel %vm250_vm1, %v2515_v42, -inf  ;;  %v275_v62 = vsel %vm250_vm1, %v2533_v55, -inf  ;;  %v2547_v0 = vadd.f32 %v2225_v38, %v2033_v29 }
  0xd2   :  { %v2216_v40 = vpop.f32.mrf.mxu0  ;;  %v219_v41 = vpop.f32.mrf.mxu1 }
  0xd3   :  { %v257_v43 = vsel %vm250_vm1, %v2513_v39, -inf  ;;  %v2521_v46 = vadd.f32 %v2216_v40, %v2033_v29  ;;  %v2541_v60 = vadd.f32 %v2033_v29, %v219_v41  ;;  %v284_v7 = vsel %vm250_vm1, %v2547_v0, -inf }
  0xd4   :  { %v189_v45 = vpop.f32.mrf.mxu0  ;;  %258 = vmax.xlane.f32.xlu1 %v257_v43  ;;  %255 = vmax.xlane.f32.xlu0 %v254_v44  ;;  %v2228_v49 = vpop.f32.mrf.mxu1 }
  0xd5   :  { %v2523_v47 = vadd.f32 %v2033_v29, %v189_v45  ;;  %v266_v56 = vsel %vm250_vm1, %v2521_v46, -inf  ;;  %v281_v3 = vsel %vm250_vm1, %v2541_v60, -inf  ;;  %v2555_v5 = vadd.f32 %v2228_v49, %v2033_v29 }
  0xd6   :  { %v2219_v48 = vpop.f32.mrf.mxu0  ;;  %v229_v57 = vpop.f32.mrf.mxu1 }
  0xd7   :  { %v263_v51 = vsel %vm250_vm1, %v2523_v47, -inf  ;;  %v2529_v53 = vadd.f32 %v2219_v48, %v2033_v29  ;;  %v2549_v1 = vadd.f32 %v2033_v29, %v229_v57  ;;  %v290_v11 = vsel %vm250_vm1, %v2555_v5, -inf }
  0xd8   :  { %v199_v52 = vpop.f32.mrf.mxu0  ;;  %261 = vmax.xlane.f32.xlu1 %v260_v50  ;;  %264 = vmax.xlane.f32.xlu0 %v263_v51  ;;  %v2231_v63 = vpop.f32.mrf.mxu1 }
  0xd9   :  { %v2531_v54 = vadd.f32 %v2033_v29, %v199_v52  ;;  %v272_v61 = vsel %vm250_vm1, %v2529_v53, -inf  ;;  %v287_v9 = vsel %vm250_vm1, %v2549_v1, -inf  ;;  %v2563_v10 = vadd.f32 %v2231_v63, %v2033_v29 }
  0xda   :  { %v239_v4 = vpop.f32.mrf.mxu1 }
  0xdb   :  { %v269_v58 = vsel %vm250_vm1, %v2531_v54, -inf  ;;  %v2557_v6 = vadd.f32 %v2033_v29, %v239_v4  ;;  %v296_v15 = vsel %vm250_vm1, %v2563_v10, -inf }
  0xdc   :  { %267 = vmax.xlane.f32.xlu1 %v266_v56  ;;  %270 = vmax.xlane.f32.xlu0 %v269_v58 }
  0xdd   :  { %v293_v14 = vsel %vm250_vm1, %v2557_v6, -inf }
  0xe0   :  { %273 = vmax.xlane.f32.xlu1 %v272_v61  ;;  %276 = vmax.xlane.f32.xlu0 %v275_v62 }
  0xe4   :  { %279 = vmax.xlane.f32.xlu1 %v278_v2  ;;  %282 = vmax.xlane.f32.xlu0 %v281_v3 }
  0xe8   :  { %285 = vmax.xlane.f32.xlu1 %v284_v7  ;;  %288 = vmax.xlane.f32.xlu0 %v287_v9 }
  0xec   :  { %291 = vmax.xlane.f32.xlu1 %v290_v11  ;;  %294 = vmax.xlane.f32.xlu0 %v293_v14 }
  0xf0   :  { %297 = vmax.xlane.f32.xlu1 %v296_v15 }
 0x159   :  { %v2574_v19 = vpop.xlane.xlu0 %252 }
 0x15a   :  { %4687 = vst [vmem:[#allocation6_spill] sm:$0xff] %v2574_v19  ;;  %vm299_vm2 = vcmp.eq.f32.partialorder %v2507_v32, %v2574_v19 }
 0x15b   :  { %v315_v20 = vsel %vm299_vm2, %v2572_v18, 4 }
 0x15c   :  { %v2580_v21 = vsel %vm250_vm1, %v315_v20, 2147483647 }
 0x15d   :  { %v2582_v24 = vpop.xlane.xlu1 %258  ;;  %v2584_v25 = vpop.xlane.xlu0 %255  ;;  %v333_v28 = vshra.s32 %v2580_v21, 16 }
 0x15e   :  { %4688 = vst [vmem:[#allocation7_spill] sm:$0xff] %v2582_v24  ;;  %4689 = vst [vmem:[#allocation8_spill] sm:$0xff] %v2584_v25  ;;  %vm301_vm3 = vcmp.eq.f32.partialorder %v2513_v39, %v2582_v24  ;;  %vm300_vm4 = vcmp.eq.f32.partialorder %v2509_v35, %v2584_v25 }
 0x15f   :  { %v317_v29 = vsel %vm301_vm3, %v2572_v18, 4  ;;  %v316_v30 = vsel %vm300_vm4, %v2572_v18, 4  ;;  %v2593_v31 = vcvt.s32.f32 %v333_v28 }
 0x160   :  { %v2596_v33 = vsel %vm250_vm1, %v317_v29, 2147483647  ;;  %v2599_v34 = vsel %vm250_vm1, %v316_v30, 2147483647 }
 0x161   :  { %v2601_v36 = vpop.xlane.xlu1 %261  ;;  %336 = vmin.xlane.f32.xlu0 %v2593_v31  ;;  %v2604_v37 = vpop.xlane.xlu0 %264  ;;  %v363_v38 = vshra.s32 %v2596_v33, 16  ;;  %v348_v40 = vshra.s32 %v2599_v34, 16 }
 0x162   :  { %4690 = vst [vmem:[#allocation9_spill] sm:$0xff] %v2601_v36  ;;  %4691 = vst [vmem:[#allocation10_spill] sm:$0xff] %v2604_v37  ;;  %vm302_vm5 = vcmp.eq.f32.partialorder %v2515_v42, %v2601_v36  ;;  %vm303_vm6 = vcmp.eq.f32.partialorder %v2523_v47, %v2604_v37 }
 0x163   :  { %v318_v41 = vsel %vm302_vm5, %v2572_v18, 4  ;;  %v319_v43 = vsel %vm303_vm6, %v2572_v18, 4  ;;  %v2614_v44 = vcvt.s32.f32 %v363_v38  ;;  %v2616_v45 = vcvt.s32.f32 %v348_v40 }
 0x164   :  { %v2619_v48 = vsel %vm250_vm1, %v318_v41, 2147483647  ;;  %v2622_v49 = vsel %vm250_vm1, %v319_v43, 2147483647 }
 0x165   :  { %v2624_v50 = vpop.xlane.xlu1 %267  ;;  %366 = vmin.xlane.f32.xlu0 %v2614_v44  ;;  %351 = vmin.xlane.f32.xlu1 %v2616_v45  ;;  %v2628_v51 = vpop.xlane.xlu0 %270  ;;  %v378_v52 = vshra.s32 %v2619_v48, 16  ;;  %v393_v56 = vshra.s32 %v2622_v49, 16  ;;  %v392_v17 = vand.u32 65535, %v2622_v49 }
 0x166   :  { %4692 = vst [vmem:[#allocation11_spill] sm:$0xff] %v2624_v50  ;;  %4693 = vst [vmem:[#allocation12_spill] sm:$0xff] %v2628_v51  ;;  %vm304_vm7 = vcmp.eq.f32.partialorder %v2521_v46, %v2624_v50  ;;  %vm305_vm8 = vcmp.eq.f32.partialorder %v2531_v54, %v2628_v51 }
 0x167   :  { %v320_v57 = vsel %vm304_vm7, %v2572_v18, 4  ;;  %v321_v58 = vsel %vm305_vm8, %v2572_v18, 4  ;;  %v2638_v61 = vcvt.s32.f32 %v378_v52  ;;  %v2640_v62 = vcvt.s32.f32 %v393_v56 }
 0x168   :  { %v2643_v63 = vsel %vm250_vm1, %v320_v57, 2147483647  ;;  %v2646_v2 = vsel %vm250_vm1, %v321_v58, 2147483647 }
 0x169   :  { %v2648_v3 = vpop.xlane.xlu1 %273  ;;  %381 = vmin.xlane.f32.xlu1 %v2638_v61  ;;  %396 = vmin.xlane.f32.xlu0 %v2640_v62  ;;  %v2652_v4 = vpop.xlane.xlu0 %276  ;;  %v408_v7 = vshra.s32 %v2643_v63, 16  ;;  %v423_v9 = vshra.s32 %v2646_v2, 16  ;;  %v422_v49 = vand.u32 65535, %v2646_v2 }
 0x16a   :  { %4694 = vst [vmem:[#allocation13_spill] sm:$0xff] %v2648_v3  ;;  %4695 = vst [vmem:[#allocation14_spill] sm:$0xff] %v2652_v4  ;;  %vm306_vm9 = vcmp.eq.f32.partialorder %v2529_v53, %v2648_v3  ;;  %vm307_vm10 = vcmp.eq.f32.partialorder %v2533_v55, %v2652_v4 }
 0x16b   :  { %v322_v11 = vsel %vm306_vm9, %v2572_v18, 4  ;;  %v323_v14 = vsel %vm307_vm10, %v2572_v18, 4  ;;  %v2662_v15 = vcvt.s32.f32 %v408_v7  ;;  %v2664_v20 = vcvt.s32.f32 %v423_v9 }
 0x16c   :  { %v2667_v28 = vsel %vm250_vm1, %v322_v11, 2147483647  ;;  %v2670_v29 = vsel %vm250_vm1, %v323_v14, 2147483647 }
 0x16d   :  { %v2672_v30 = vpop.xlane.xlu1 %279  ;;  %411 = vmin.xlane.f32.xlu1 %v2662_v15  ;;  %426 = vmin.xlane.f32.xlu0 %v2664_v20  ;;  %v2676_v38 = vpop.xlane.xlu0 %282  ;;  %v438_v40 = vshra.s32 %v2667_v28, 16  ;;  %v453_v41 = vshra.s32 %v2670_v29, 16  ;;  %v452_v2 = vand.u32 65535, %v2670_v29 }
 0x16e   :  { %4696 = vst [vmem:[#allocation15_spill] sm:$0xff] %v2672_v30  ;;  %4697 = vst [vmem:[#allocation16_spill] sm:$0xff] %v2676_v38  ;;  %vm308_vm11 = vcmp.eq.f32.partialorder %v2539_v59, %v2672_v30  ;;  %vm309_vm12 = vcmp.eq.f32.partialorder %v2541_v60, %v2676_v38 }
 0x16f   :  { %v324_v43 = vsel %vm308_vm11, %v2572_v18, 4  ;;  %v325_v52 = vsel %vm309_vm12, %v2572_v18, 4  ;;  %v2686_v56 = vcvt.s32.f32 %v438_v40  ;;  %v2688_v57 = vcvt.s32.f32 %v453_v41 }
 0x170   :  { %v2691_v58 = vsel %vm250_vm1, %v324_v43, 2147483647  ;;  %v2694_v7 = vsel %vm250_vm1, %v325_v52, 2147483647 }
 0x171   :  { %v2696_v9 = vpop.xlane.xlu1 %285  ;;  %441 = vmin.xlane.f32.xlu1 %v2686_v56  ;;  %456 = vmin.xlane.f32.xlu0 %v2688_v57  ;;  %v2700_v11 = vpop.xlane.xlu0 %288  ;;  %v468_v14 = vshra.s32 %v2691_v58, 16  ;;  %v483_v40 = vshra.s32 %v2694_v7, 16  ;;  %v482_v29 = vand.u32 65535, %v2694_v7 }
 0x172   :  { %4698 = vst [vmem:[#allocation17_spill] sm:$0xff] %v2696_v9  ;;  %4699 = vst [vmem:[#allocation18_spill] sm:$0xff] %v2700_v11  ;;  %vm310_vm13 = vcmp.eq.f32.partialorder %v2547_v0, %v2696_v9  ;;  %vm311_vm14 = vcmp.eq.f32.partialorder %v2549_v1, %v2700_v11 }
 0x173   :  { %v326_v41 = vsel %vm310_vm13, %v2572_v18, 4  ;;  %v327_v43 = vsel %vm311_vm14, %v2572_v18, 4  ;;  %v2710_v52 = vcvt.s32.f32 %v468_v14  ;;  %v2712_v16 = vcvt.s32.f32 %v483_v40 }
 0x174   :  { %v2715_v38 = vsel %vm250_vm1, %v326_v41, 2147483647  ;;  %v2718_v30 = vsel %vm250_vm1, %v327_v43, 2147483647 }
 0x175   :  { %v2720_v4 = vpop.xlane.xlu1 %291  ;;  %471 = vmin.xlane.f32.xlu1 %v2710_v52  ;;  %486 = vmin.xlane.f32.xlu0 %v2712_v16  ;;  %v2724_v11 = vpop.xlane.xlu0 %294  ;;  %v498_v9 = vshra.s32 %v2715_v38, 16  ;;  %v513_v14 = vshra.s32 %v2718_v30, 16  ;;  %v512_v7 = vand.u32 65535, %v2718_v30 }
 0x176   :  { %4700 = vst [vmem:[#allocation19_spill] sm:$0xff] %v2720_v4  ;;  %4701 = vst [vmem:[#allocation20_spill] sm:$0xff] %v2724_v11  ;;  %vm312_vm15 = vcmp.eq.f32.partialorder %v2555_v5, %v2720_v4  ;;  %vm313_vm2 = vcmp.eq.f32.partialorder %v2557_v6, %v2724_v11 }
 0x177   :  { %v328_v40 = vsel %vm312_vm15, %v2572_v18, 4  ;;  %v329_v41 = vsel %vm313_vm2, %v2572_v18, 4  ;;  %v2734_v43 = vcvt.s32.f32 %v498_v9  ;;  %v2736_v3 = vcvt.s32.f32 %v513_v14 }
 0x178   :  { %v2739_v51 = vsel %vm250_vm1, %v328_v40, 2147483647  ;;  %v2742_v50 = vsel %vm250_vm1, %v329_v41, 2147483647 }
 0x179   :  { %v2744_v37 = vpop.xlane.xlu1 %297  ;;  %501 = vmin.xlane.f32.xlu1 %v2734_v43  ;;  %516 = vmin.xlane.f32.xlu0 %v2736_v3  ;;  %v528_v11 = vshra.s32 %v2739_v51, 16  ;;  %v543_v4 = vshra.s32 %v2742_v50, 16  ;;  %v542_v30 = vand.u32 65535, %v2742_v50 }
 0x17a   :  { %4702 = vst [vmem:[#allocation21_spill] sm:$0xff] %v2744_v37  ;;  %vm314_vm3 = vcmp.eq.f32.partialorder %v2563_v10, %v2744_v37  ;;  %v332_v37 = vand.u32 65535, %v2580_v21  ;;  %v377_v21 = vand.u32 65535, %v2619_v48  ;;  %v407_v48 = vand.u32 65535, %v2643_v63 }
 0x17b   :  { %v330_v9 = vsel %vm314_vm3, %v2572_v18, 4  ;;  %v2753_v14 = vcvt.s32.f32 %v528_v11  ;;  %v2755_v40 = vcvt.s32.f32 %v543_v4  ;;  %v347_v4 = vand.u32 65535, %v2599_v34 }
 0x17c   :  { %v2758_v41 = vsel %vm250_vm1, %v330_v9, 2147483647  ;;  %v334_v11 = vcvt.s32.f32 %v332_v37  ;;  %v362_v9 = vand.u32 65535, %v2596_v33  ;;  %v379_v37 = vcvt.s32.f32 %v377_v21 }
 0x17d   :  { %531 = vmin.xlane.f32.xlu1 %v2753_v14  ;;  %546 = vmin.xlane.f32.xlu0 %v2755_v40  ;;  %v558_v36 = vshra.s32 %v2758_v41, 16  ;;  %v349_v23 = vcvt.s32.f32 %v347_v4  ;;  %v409_v4 = vcvt.s32.f32 %v407_v48  ;;  %v437_v63 = vand.u32 65535, %v2667_v28 }
 0x17e   :  { %v364_v22 = vcvt.s32.f32 %v362_v9  ;;  %v467_v28 = vand.u32 65535, %v2691_v58  ;;  %v497_v58 = vand.u32 65535, %v2715_v38  ;;  %v527_v38 = vand.u32 65535, %v2739_v51 }
 0x17f   :  { %v2763_v24 = vcvt.s32.f32 %v558_v36  ;;  %v557_v51 = vand.u32 65535, %v2758_v41 }
 0x180   :  { %v469_v48 = vcvt.s32.f32 %v467_v28 }
 0x181   :  { %561 = vmin.xlane.f32.xlu1 %v2763_v24 }
 0x1ea   :  { %v2767_v25 = vpop.xlane.xlu0 %336 }
 0x1eb   :  { %vm338_vm4 = vcmp.eq.f32.partialorder %v2593_v31, %v2767_v25  ;;  %v343_v41 = vcvt.f32.s32 %v2767_v25 }
 0x1ec   :  { %v339_v19 = vsel %vm338_vm4, %v334_v11, inf  ;;  %v394_v11 = vcvt.s32.f32 %v392_v17  ;;  %v424_v17 = vcvt.s32.f32 %v422_v49  ;;  %v484_v49 = vcvt.s32.f32 %v482_v29 }
 0x1ed   :  { %340 = vmin.xlane.f32.xlu0 %v339_v19 }
 0x1ee   :  { %v2773_v26 = vpop.xlane.xlu1 %351  ;;  %v2775_v36 = vpop.xlane.xlu0 %366 }
 0x1ef   :  { %vm353_vm5 = vcmp.eq.f32.partialorder %v2616_v45, %v2773_v26  ;;  %vm368_vm6 = vcmp.eq.f32.partialorder %v2614_v44, %v2775_v36  ;;  %v358_v28 = vcvt.f32.s32 %v2773_v26 }
 0x1f0   :  { %v354_v33 = vsel %vm353_vm5, %v349_v23, inf  ;;  %v369_v31 = vsel %vm368_vm6, %v364_v22, inf }
 0x1f1   :  { %355 = vmin.xlane.f32.xlu1 %v354_v33  ;;  %370 = vmin.xlane.f32.xlu0 %v369_v31  ;;  %v439_v33 = vcvt.s32.f32 %v437_v63  ;;  %v454_v31 = vcvt.s32.f32 %v452_v2 }
 0x1f2   :  { %v2783_v19 = vpop.xlane.xlu1 %381  ;;  %v2785_v34 = vpop.xlane.xlu0 %396 }
 0x1f3   :  { %vm383_vm7 = vcmp.eq.f32.partialorder %v2638_v61, %v2783_v19  ;;  %vm398_vm8 = vcmp.eq.f32.partialorder %v2640_v62, %v2785_v34 }
 0x1f4   :  { %v384_v23 = vsel %vm383_vm7, %v379_v37, inf  ;;  %v399_v22 = vsel %vm398_vm8, %v394_v11, inf }
 0x1f5   :  { %385 = vmin.xlane.f32.xlu1 %v384_v23  ;;  %400 = vmin.xlane.f32.xlu0 %v399_v22 }
 0x1f6   :  { %v2793_v44 = vpop.xlane.xlu1 %411  ;;  %v2795_v45 = vpop.xlane.xlu0 %426 }
 0x1f7   :  { %vm413_vm9 = vcmp.eq.f32.partialorder %v2662_v15, %v2793_v44  ;;  %vm428_vm10 = vcmp.eq.f32.partialorder %v2664_v20, %v2795_v45  ;;  %v418_v26 = vcvt.f32.s32 %v2793_v44 }
 0x1f8   :  { %v414_v61 = vsel %vm413_vm9, %v409_v4, inf  ;;  %v429_v62 = vsel %vm428_vm10, %v424_v17, inf  ;;  %v499_v4 = vcvt.s32.f32 %v497_v58  ;;  %v514_v17 = vcvt.s32.f32 %v512_v7 }
 0x1f9   :  { %415 = vmin.xlane.f32.xlu1 %v414_v61  ;;  %430 = vmin.xlane.f32.xlu0 %v429_v62  ;;  %v529_v61 = vcvt.s32.f32 %v527_v38  ;;  %v544_v62 = vcvt.s32.f32 %v542_v30  ;;  %v388_v58 = vcvt.f32.s32 %v2783_v19  ;;  %v433_v38 = vcvt.f32.s32 %v2795_v45 }
 0x1fa   :  { %v2803_v9 = vpop.xlane.xlu1 %441  ;;  %v2805_v21 = vpop.xlane.xlu0 %456  ;;  %v419_v44 = vshll.u32 %v418_v26, 16 }
 0x1fb   :  { %vm443_vm11 = vcmp.eq.f32.partialorder %v2686_v56, %v2803_v9  ;;  %vm458_vm12 = vcmp.eq.f32.partialorder %v2688_v57, %v2805_v21 }
 0x1fc   :  { %v444_v15 = vsel %vm443_vm11, %v439_v33, inf  ;;  %v459_v20 = vsel %vm458_vm12, %v454_v31, inf  ;;  %v559_v33 = vcvt.s32.f32 %v557_v51 }
 0x1fd   :  { %445 = vmin.xlane.f32.xlu1 %v444_v15  ;;  %460 = vmin.xlane.f32.xlu0 %v459_v20 }
 0x1fe   :  { %v2813_v37 = vpop.xlane.xlu1 %471  ;;  %v2815_v11 = vpop.xlane.xlu0 %486 }
 0x1ff   :  { %vm473_vm13 = vcmp.eq.f32.partialorder %v2710_v52, %v2813_v37  ;;  %vm488_vm14 = vcmp.eq.f32.partialorder %v2712_v16, %v2815_v11 }
 0x200   :  { %v474_v56 = vsel %vm473_vm13, %v469_v48, inf  ;;  %v489_v57 = vsel %vm488_vm14, %v484_v49, inf  ;;  %v359_v48 = vshll.u32 %v358_v28, 16 }
 0x201   :  { %475 = vmin.xlane.f32.xlu1 %v474_v56  ;;  %490 = vmin.xlane.f32.xlu0 %v489_v57 }
 0x202   :  { %v2823_v23 = vpop.xlane.xlu1 %501  ;;  %v2825_v22 = vpop.xlane.xlu0 %516 }
 0x203   :  { %vm503_vm15 = vcmp.eq.f32.partialorder %v2734_v43, %v2823_v23  ;;  %vm518_vm2 = vcmp.eq.f32.partialorder %v2736_v3, %v2825_v22 }
 0x204   :  { %v504_v16 = vsel %vm503_vm15, %v499_v4, inf  ;;  %v519_v52 = vsel %vm518_vm2, %v514_v17, inf }
 0x205   :  { %505 = vmin.xlane.f32.xlu1 %v504_v16  ;;  %520 = vmin.xlane.f32.xlu0 %v519_v52  ;;  %v389_v16 = vshll.u32 %v388_v58, 16  ;;  %v478_v58 = vcvt.f32.s32 %v2813_v37 }
 0x206   :  { %v2833_v63 = vpop.xlane.xlu1 %531  ;;  %v2835_v2 = vpop.xlane.xlu0 %546 }
 0x207   :  { %vm533_vm3 = vcmp.eq.f32.partialorder %v2753_v14, %v2833_v63  ;;  %vm548_vm4 = vcmp.eq.f32.partialorder %v2755_v40, %v2835_v2  ;;  %v373_v14 = vcvt.f32.s32 %v2775_v36  ;;  %v344_v40 = vshll.u32 %v343_v41, 16 }
 0x208   :  { %v534_v50 = vsel %vm533_vm3, %v529_v61, inf  ;;  %v549_v3 = vsel %vm548_vm4, %v544_v62, inf }
 0x209   :  { %535 = vmin.xlane.f32.xlu1 %v534_v50  ;;  %550 = vmin.xlane.f32.xlu0 %v549_v3  ;;  %v374_v49 = vshll.u32 %v373_v14, 16  ;;  %v434_v3 = vshll.u32 %v433_v38, 16 }
 0x20a   :  { %v2842_v43 = vpop.xlane.xlu1 %561 }
 0x20b   :  { %vm563_vm5 = vcmp.eq.f32.partialorder %v2763_v24, %v2842_v43  ;;  %v403_v24 = vcvt.f32.s32 %v2785_v34 }
 0x20c   :  { %v564_v31 = vsel %vm563_vm5, %v559_v33, inf  ;;  %v448_v33 = vcvt.f32.s32 %v2803_v9 }
 0x20d   :  { %565 = vmin.xlane.f32.xlu1 %v564_v31  ;;  %v404_v52 = vshll.u32 %v403_v24, 16 }
 0x276   :  { %v341_v29 = vpop.xlane.xlu0 %340 }
 0x277   :  { %v342_v15 = vcvt.f32.s32 %v341_v29  ;;  %v463_v29 = vcvt.f32.s32 %v2805_v21 }
 0x279   :  { %v2849_v20 = vadd.s32 %v344_v40, %v342_v15 }
 0x27a   :  { %v356_v7 = vpop.xlane.xlu1 %355  ;;  %v371_v56 = vpop.xlane.xlu0 %370 }
 0x27b   :  { %4703 = vst [vmem:[#allocation22_spill] sm:$0xff] %v2849_v20  ;;  %v357_v57 = vcvt.f32.s32 %v356_v7  ;;  %v372_v4 = vcvt.f32.s32 %v371_v56  ;;  %vm571_vm6 = vcmp.eq.s32.totalorder %v2572_v18, %v2849_v20  ;;  %v493_v7 = vcvt.f32.s32 %v2815_v11 }
 0x27c   :  { %v2857_v25 = vsel %vm571_vm6, -inf, %v2507_v32 }
 0x27d   :  { %v2859_v36 = vadd.s32 %v359_v48, %v357_v57  ;;  %v2861_v17 = vadd.s32 %v374_v49, %v372_v4  ;;  %v603_v19 = vsel %vm250_vm1, %v2857_v25, -inf  ;;  %v449_v49 = vshll.u32 %v448_v33, 16 }
 0x27e   :  { %v386_v34 = vpop.xlane.xlu1 %385  ;;  %604 = vmax.xlane.f32.xlu0 %v603_v19  ;;  %v401_v30 = vpop.xlane.xlu0 %400  ;;  %v464_v57 = vshll.u32 %v463_v29, 16 }
 0x27f   :  { %4704 = vst [vmem:[#allocation23_spill] sm:$0xff] %v2859_v36  ;;  %4705 = vst [vmem:[#allocation24_spill] sm:$0xff] %v2861_v17  ;;  %v387_v61 = vcvt.f32.s32 %v386_v34  ;;  %v402_v62 = vcvt.f32.s32 %v401_v30  ;;  %vm572_vm7 = vcmp.eq.s32.totalorder %v2572_v18, %v2859_v36  ;;  %vm573_vm8 = vcmp.eq.s32.totalorder %v2572_v18, %v2861_v17 }
 0x280   :  { %v2875_v45 = vsel %vm572_vm7, -inf, %v2509_v35  ;;  %v2878_v50 = vsel %vm573_vm8, -inf, %v2513_v39  ;;  %v479_v34 = vshll.u32 %v478_v58, 16  ;;  %v494_v30 = vshll.u32 %v493_v7, 16 }
 0x281   :  { %v2870_v32 = vadd.s32 %v389_v16, %v387_v61  ;;  %v2872_v51 = vadd.s32 %v404_v52, %v402_v62  ;;  %v606_v31 = vsel %vm250_vm1, %v2875_v45, -inf  ;;  %v609_v28 = vsel %vm250_vm1, %v2878_v50, -inf }
 0x282   :  { %v416_v41 = vpop.xlane.xlu1 %415  ;;  %v431_v14 = vpop.xlane.xlu0 %430  ;;  %607 = vmax.xlane.f32.xlu1 %v606_v31  ;;  %610 = vmax.xlane.f32.xlu0 %v609_v28  ;;  %v508_v16 = vcvt.f32.s32 %v2823_v23  ;;  %v523_v62 = vcvt.f32.s32 %v2825_v22  ;;  %v538_v28 = vcvt.f32.s32 %v2833_v63 }
 0x283   :  { %4706 = vst [vmem:[#allocation25_spill] sm:$0xff] %v2870_v32  ;;  %4707 = vst [vmem:[#allocation26_spill] sm:$0xff] %v2872_v51  ;;  %v417_v40 = vcvt.f32.s32 %v416_v41  ;;  %v432_v35 = vcvt.f32.s32 %v431_v14  ;;  %vm574_vm9 = vcmp.eq.s32.totalorder %v2572_v18, %v2870_v32  ;;  %vm575_vm10 = vcmp.eq.s32.totalorder %v2572_v18, %v2872_v51 }
 0x284   :  { %v2889_v39 = vsel %vm574_vm9, -inf, %v2515_v42  ;;  %v2900_v48 = vsel %vm575_vm10, -inf, %v2523_v47  ;;  %v509_v41 = vshll.u32 %v508_v16, 16  ;;  %v553_v14 = vcvt.f32.s32 %v2835_v2 }
 0x285   :  { %v2893_v9 = vadd.s32 %v419_v44, %v417_v40  ;;  %v2895_v15 = vadd.s32 %v434_v3, %v432_v35  ;;  %v612_v21 = vsel %vm250_vm1, %v2889_v39, -inf  ;;  %v615_v56 = vsel %vm250_vm1, %v2900_v48, -inf }
 0x286   :  { %v446_v42 = vpop.xlane.xlu1 %445  ;;  %v461_v24 = vpop.xlane.xlu0 %460  ;;  %613 = vmax.xlane.f32.xlu1 %v612_v21  ;;  %616 = vmax.xlane.f32.xlu0 %v615_v56  ;;  %v524_v35 = vshll.u32 %v523_v62, 16  ;;  %v554_v56 = vshll.u32 %v553_v14, 16  ;;  %v2282_v14 = vld [vmem:[%s4554_s3 + $0x1c] ss:$12 sps:$4 sm:$0xff]  }
 0x287   :  { %4708 = vst [vmem:[#allocation27_spill] sm:$0xff] %v2893_v9  ;;  %4709 = vst [vmem:[#allocation28_spill] sm:$0xff] %v2895_v15  ;;  %v447_v4 = vcvt.f32.s32 %v446_v42  ;;  %v462_v26 = vcvt.f32.s32 %v461_v24  ;;  %vm576_vm11 = vcmp.eq.s32.totalorder %v2572_v18, %v2893_v9  ;;  %vm577_vm12 = vcmp.eq.s32.totalorder %v2572_v18, %v2895_v15  ;;  %1136 = vmatprep.subr.bf16.mxu1 %v2282_v14 }
 0x288   :  { %v2909_v47 = vsel %vm576_vm11, -inf, %v2521_v46  ;;  %v2920_v38 = vsel %vm577_vm12, -inf, %v2531_v54  ;;  %v539_v42 = vshll.u32 %v538_v28, 16  ;;  %v2369_v28 = vmov 0  }
 0x289   :  { %v2913_v37 = vadd.s32 %v449_v49, %v447_v4  ;;  %v2915_v11 = vadd.s32 %v464_v57, %v462_v26  ;;  %v618_v19 = vsel %vm250_vm1, %v2909_v47, -inf  ;;  %v621_v46 = vsel %vm250_vm1, %v2920_v38, -inf  ;;  %1156 = vmatprep.mubr.bf16.mxu1 %v2369_v28 }
 0x28a   :  { %v476_v52 = vpop.xlane.xlu1 %475  ;;  %v491_v61 = vpop.xlane.xlu0 %490  ;;  %619 = vmax.xlane.f32.xlu1 %v618_v19  ;;  %622 = vmax.xlane.f32.xlu0 %v621_v46  ;;  %v568_v4 = vcvt.f32.s32 %v2842_v43 }
 0x28b   :  { %4710 = vst [vmem:[#allocation29_spill] sm:$0xff] %v2913_v37  ;;  %4711 = vst [vmem:[#allocation30_spill] sm:$0xff] %v2915_v11  ;;  %v477_v44 = vcvt.f32.s32 %v476_v52  ;;  %v492_v3 = vcvt.f32.s32 %v491_v61  ;;  %vm578_vm13 = vcmp.eq.s32.totalorder %v2572_v18, %v2913_v37  ;;  %vm579_vm14 = vcmp.eq.s32.totalorder %v2572_v18, %v2915_v11 }
 0x28c   :  { %v2929_v54 = vsel %vm578_vm13, -inf, %v2529_v53  ;;  %v2940_v31 = vsel %vm579_vm14, -inf, %v2533_v55  ;;  %v569_v61 = vshll.u32 %v568_v4, 16 }
 0x28d   :  { %v2933_v23 = vadd.s32 %v479_v34, %v477_v44  ;;  %v2935_v33 = vadd.s32 %v494_v30, %v492_v3  ;;  %v624_v22 = vsel %vm250_vm1, %v2929_v54, -inf  ;;  %v627_v29 = vsel %vm250_vm1, %v2940_v31, -inf }
 0x28e   :  { %v506_v53 = vpop.xlane.xlu1 %505  ;;  %v521_v40 = vpop.xlane.xlu0 %520  ;;  %625 = vmax.xlane.f32.xlu1 %v624_v22  ;;  %628 = vmax.xlane.f32.xlu0 %v627_v29  ;;  %v2283_v29 = vld [vmem:[%s4554_s3] ss:$12 sps:$4 sm:$0xff]  }
 0x28f   :  { %4712 = vst [vmem:[#allocation31_spill] sm:$0xff] %v2933_v23  ;;  %4713 = vst [vmem:[#allocation32_spill] sm:$0xff] %v2935_v33  ;;  %v507_v21 = vcvt.f32.s32 %v506_v53  ;;  %v522_v49 = vcvt.f32.s32 %v521_v40  ;;  %vm580_vm15 = vcmp.eq.s32.totalorder %v2572_v18, %v2933_v23  ;;  %vm581_vm2 = vcmp.eq.s32.totalorder %v2572_v18, %v2935_v33  ;;  %v2285_v53 = vld [vmem:[%s4554_s3 + $0x4] ss:$12 sps:$4 sm:$0xff]   ;;  %v2287_v40 = vld [vmem:[%s4554_s3 + $0x8] ss:$12 sps:$4 sm:$0xff]  }
 0x290   :  { %v2949_v55 = vsel %vm580_vm15, -inf, %v2539_v59  ;;  %v2960_v7 = vsel %vm581_vm2, -inf, %v2541_v60  ;;  %v2293_v33 = vld [vmem:[%s4555_s5 + $0x68] sm:$0xff]  }
 0x291   :  { %v2953_v63 = vadd.s32 %v509_v41, %v507_v21  ;;  %v2955_v2 = vadd.s32 %v524_v35, %v522_v49  ;;  %v630_v58 = vsel %vm250_vm1, %v2949_v55, -inf  ;;  %v633_v59 = vsel %vm250_vm1, %v2960_v7, -inf  ;;  %v4719_v35 = vld [vmem:[#allocation2_spill] sm:$0xff]  ;;  %v4721_v21 = vld [vmem:[#allocation4_spill] sm:$0xff] }
 0x292   :  { %v536_v24 = vpop.xlane.xlu1 %535  ;;  %v551_v57 = vpop.xlane.xlu0 %550  ;;  %631 = vmax.xlane.f32.xlu1 %v630_v58  ;;  %634 = vmax.xlane.f32.xlu0 %v633_v59 }
 0x293   :  { %4714 = vst [vmem:[#allocation33_spill] sm:$0xff] %v2953_v63  ;;  %4715 = vst [vmem:[#allocation34_spill] sm:$0xff] %v2955_v2  ;;  %v537_v26 = vcvt.f32.s32 %v536_v24  ;;  %v552_v19 = vcvt.f32.s32 %v551_v57  ;;  %vm582_vm3 = vcmp.eq.s32.totalorder %v2572_v18, %v2953_v63  ;;  %vm583_vm4 = vcmp.eq.s32.totalorder %v2572_v18, %v2955_v2 }
 0x294   :  { %v2968_v34 = vsel %vm582_vm3, -inf, %v2547_v0  ;;  %v2979_v16 = vsel %vm583_vm4, -inf, %v2549_v1 }
 0x295   :  { %v2972_v60 = vadd.s32 %v539_v42, %v537_v26  ;;  %v2974_v30 = vadd.s32 %v554_v56, %v552_v19  ;;  %v636_v43 = vsel %vm250_vm1, %v2968_v34, -inf  ;;  %v639_v46 = vsel %vm250_vm1, %v2979_v16, -inf }
 0x296   :  { %v566_v52 = vpop.xlane.xlu1 %565  ;;  %637 = vmax.xlane.f32.xlu1 %v636_v43  ;;  %640 = vmax.xlane.f32.xlu0 %v639_v46 }
 0x297   :  { %4716 = vst [vmem:[#allocation35_spill] sm:$0xff] %v2972_v60  ;;  %4717 = vst [vmem:[#allocation36_spill] sm:$0xff] %v2974_v30  ;;  %v567_v0 = vcvt.f32.s32 %v566_v52  ;;  %vm584_vm5 = vcmp.eq.s32.totalorder %v2572_v18, %v2972_v60  ;;  %vm585_vm6 = vcmp.eq.s32.totalorder %v2572_v18, %v2974_v30 }
 0x298   :  { %v2988_v62 = vsel %vm584_vm5, -inf, %v2555_v5  ;;  %v2991_v1 = vsel %vm585_vm6, -inf, %v2557_v6  ;;  %v2280_v6 = vld [vmem:[%s4554_s3 + $0x18] ss:$12 sps:$4 sm:$0xff]  }
 0x299   :  { %v2993_v44 = vadd.s32 %v569_v61, %v567_v0  ;;  %v642_v3 = vsel %vm250_vm1, %v2988_v62, -inf  ;;  %v645_v22 = vsel %vm250_vm1, %v2991_v1, -inf  ;;  %1137 = vmatpush1.bf16.msra.mxu1 %v2280_v6 }
 0x29a   :  { %643 = vmax.xlane.f32.xlu1 %v642_v3  ;;  %646 = vmax.xlane.f32.xlu0 %v645_v22 }
 0x29b   :  { %4718 = vst [vmem:[#allocation37_spill] sm:$0xff] %v2993_v44  ;;  %vm586_vm7 = vcmp.eq.s32.totalorder %v2572_v18, %v2993_v44  ;;  %1138 = vmatprep.subr.bf16.mxu1 %v2285_v53 }
 0x29c   :  { %v3002_v41 = vsel %vm586_vm7, -inf, %v2563_v10  ;;  %v2286_v10 = vld [vmem:[%s4554_s3 + $0x20] ss:$12 sps:$4 sm:$0xff]  }
 0x29d   :  { %v648_v5 = vsel %vm250_vm1, %v3002_v41, -inf  ;;  %2232 = vmatprep.subr.bf16.mxu0 %v2286_v10  ;;  %1139 = vmatpush1.bf16.msra.mxu1 %v2283_v29 }
 0x29e   :  { %649 = vmax.xlane.f32.xlu1 %v648_v5  ;;  %2233 = vmatpush3.bf16.msra.mxu0 %v2286_v10 }
 0x29f   :  { %2234 = vmatprep.subr.bf16.mxu0 %v2287_v40 }
 0x2a0   :  { %2056 = vmatmul.mubr.msk.bf16.vlgmr.msra.gmra.mxu1 %vm4682_vm0, %v2497_v27  ;;  %v4720_v27 = vld [vmem:[#allocation3_spill] sm:$0xff] }
 0x2a1   :  { %1166 = vmatprep.mubr.bf16.mxu1 %v2369_v28 }
 0x2a2   :  { %2235 = vmatpush3.bf16.msra.mxu0 %v2287_v40 }
 0x2a5   :  { %2237 = vmatmul.mubr.msk.bf16.vlgmr.msra.gmra.mxu0 %vm4682_vm0, %v2435_v8 }
 0x2a6   :  { %2240 = vmatprep.mubr.msk.bf16.mxu0 %vm4682_vm0, %v2446_v12 }
 0x2a8   :  { %2057 = vmatmul.mubr.msk.bf16.gmra.mxu1 %vm4682_vm0, %v2435_v8  ;;  %v4722_v8 = vld [vmem:[#allocation5_spill] sm:$0xff] }
 0x2a9   :  { %1176 = vmatprep.mubr.bf16.mxu1 %v2369_v28 }
 0x2ad   :  { %2241 = vmatmul.mubr.msk.bf16.gmra.mxu0 %vm4682_vm0, %v2448_v13 }
 0x2ae   :  { %2244 = vmatprep.mubr.msk.bf16.mxu0 %vm4682_vm0, %v4719_v35 }
 0x2b0   :  { %2058 = vmatmul.mubr.msk.bf16.gmra.mxu1 %vm4682_vm0, %v2446_v12 }
 0x2b1   :  { %1186 = vmatprep.mubr.bf16.mxu1 %v2369_v28 }
 0x2b5   :  { %2245 = vmatmul.mubr.msk.bf16.gmra.mxu0 %vm4682_vm0, %v4720_v27 }
 0x2b6   :  { %2248 = vmatprep.mubr.msk.bf16.mxu0 %vm4682_vm0, %v4721_v21 }
 0x2b8   :  { %2059 = vmatmul.mubr.msk.bf16.gmra.mxu1 %vm4682_vm0, %v2448_v13 }
 0x2b9   :  { %1196 = vmatprep.mubr.bf16.mxu1 %v2369_v28 }
 0x2bd   :  { %2249 = vmatmul.mubr.msk.bf16.gmra.mxu0 %vm4682_vm0, %v4722_v8 }
 0x2c0   :  { %2060 = vmatmul.mubr.msk.bf16.gmra.mxu1 %vm4682_vm0, %v4719_v35 }
 0x2c1   :  { %1206 = vmatprep.mubr.bf16.mxu1 %v2369_v28 }
 0x2c8   :  { %2061 = vmatmul.mubr.msk.bf16.gmra.mxu1 %vm4682_vm0, %v4720_v27 }
 0x2c9   :  { %1216 = vmatprep.mubr.bf16.mxu1 %v2369_v28 }
 0x2d0   :  { %2062 = vmatmul.mubr.msk.bf16.gmra.mxu1 %vm4682_vm0, %v4721_v21 }
 0x2d1   :  { %1226 = vmatprep.mubr.bf16.mxu1 %v2369_v28 }
 0x2d8   :  { %2063 = vmatmul.mubr.msk.bf16.gmra.mxu1 %vm4682_vm0, %v4722_v8 }
 0x307   :  { %v3054_v12 = vpop.xlane.xlu0 %604 }
 0x308   :  { %vm651_vm8 = vcmp.eq.f32.partialorder %v2857_v25, %v3054_v12 }
 0x309   :  { %v667_v13 = vsel %vm651_vm8, %v2572_v18, 4 }
 0x30a   :  { %v3060_v49 = vsel %vm250_vm1, %v667_v13, 2147483647 }
 0x30b   :  { %v685_v58 = vshra.s32 %v3060_v49, 16  ;;  %v3063_v42 = vpop.xlane.xlu1 %607  ;;  %v3065_v56 = vpop.xlane.xlu0 %610 }
 0x30c   :  { %vm652_vm9 = vcmp.eq.f32.partialorder %v2875_v45, %v3063_v42  ;;  %vm653_vm10 = vcmp.eq.f32.partialorder %v2878_v50, %v3065_v56 }
 0x30d   :  { %v668_v24 = vsel %vm652_vm9, %v2572_v18, 4  ;;  %v669_v25 = vsel %vm653_vm10, %v2572_v18, 4  ;;  %v3073_v59 = vcvt.s32.f32 %v685_v58  ;;  %vm1815_vm10 = vcmask 1041408  }
 0x30e   :  { %v3076_v57 = vsel %vm250_vm1, %v668_v24, 2147483647  ;;  %v3085_v19 = vsel %vm250_vm1, %v669_v25, 2147483647 }
 0x30f   :  { %v3078_v4 = vpop.xlane.xlu1 %613  ;;  %688 = vmin.xlane.f32.xlu0 %v3073_v59  ;;  %v3081_v26 = vpop.xlane.xlu0 %616  ;;  %v700_v45 = vshra.s32 %v3076_v57, 16  ;;  %v715_v46 = vshra.s32 %v3085_v19, 16  ;;  %v699_v11 = vand.u32 65535, %v3076_v57  ;;  %v714_v9 = vand.u32 65535, %v3085_v19 }
 0x310   :  { %vm654_vm11 = vcmp.eq.f32.partialorder %v2889_v39, %v3078_v4  ;;  %vm655_vm12 = vcmp.eq.f32.partialorder %v2900_v48, %v3081_v26 }
 0x311   :  { %v670_v50 = vsel %vm654_vm11, %v2572_v18, 4  ;;  %v671_v43 = vsel %vm655_vm12, %v2572_v18, 4  ;;  %v3093_v52 = vcvt.s32.f32 %v700_v45  ;;  %v3110_v48 = vcvt.s32.f32 %v715_v46 }
 0x312   :  { %v3097_v61 = vsel %vm250_vm1, %v670_v50, 2147483647  ;;  %v3105_v22 = vsel %vm250_vm1, %v671_v43, 2147483647 }
 0x313   :  { %v3099_v0 = vpop.xlane.xlu1 %619  ;;  %v3101_v3 = vpop.xlane.xlu0 %622  ;;  %v730_v39 = vshra.s32 %v3097_v61, 16  ;;  %703 = vmin.xlane.f32.xlu1 %v3093_v52  ;;  %718 = vmin.xlane.f32.xlu0 %v3110_v48  ;;  %v745_v14 = vshra.s32 %v3105_v22, 16 }
 0x314   :  { %vm656_vm13 = vcmp.eq.f32.partialorder %v2909_v47, %v3099_v0  ;;  %vm657_vm14 = vcmp.eq.f32.partialorder %v2920_v38, %v3101_v3 }
 0x315   :  { %v672_v5 = vsel %vm656_vm13, %v2572_v18, 4  ;;  %v673_v6 = vsel %vm657_vm14, %v2572_v18, 4  ;;  %v3117_v28 = vcvt.s32.f32 %v730_v39  ;;  %v3130_v38 = vcvt.s32.f32 %v745_v14 }
 0x316   :  { %v3125_v47 = vsel %vm250_vm1, %v672_v5, 2147483647  ;;  %v3133_v29 = vsel %vm250_vm1, %v673_v6, 2147483647 }
 0x317   :  { %v3120_v53 = vpop.xlane.xlu1 %625  ;;  %v3122_v10 = vpop.xlane.xlu0 %628  ;;  %733 = vmin.xlane.f32.xlu1 %v3117_v28  ;;  %748 = vmin.xlane.f32.xlu0 %v3130_v38  ;;  %v760_v27 = vshra.s32 %v3125_v47, 16 }
 0x318   :  { %vm658_vm15 = vcmp.eq.f32.partialorder %v2929_v54, %v3120_v53  ;;  %vm659_vm2 = vcmp.eq.f32.partialorder %v2940_v31, %v3122_v10  ;;  %v775_v54 = vshra.s32 %v3133_v29, 16 }
 0x319   :  { %v674_v40 = vsel %vm658_vm15, %v2572_v18, 4  ;;  %v675_v35 = vsel %vm659_vm2, %v2572_v18, 4  ;;  %v3146_v13 = vcvt.s32.f32 %v760_v27 }
 0x31a   :  { %v3149_v58 = vsel %vm250_vm1, %v674_v40, 2147483647  ;;  %v3152_v24 = vsel %vm250_vm1, %v675_v35, 2147483647  ;;  %v3154_v31 = vcvt.s32.f32 %v775_v54 }
 0x31b   :  { %v3141_v21 = vpop.xlane.xlu1 %631  ;;  %v3144_v8 = vpop.xlane.xlu0 %634  ;;  %763 = vmin.xlane.f32.xlu1 %v3146_v13  ;;  %v790_v25 = vshra.s32 %v3149_v58, 16  ;;  %v805_v50 = vshra.s32 %v3152_v24, 16 }
 0x31c   :  { %vm660_vm3 = vcmp.eq.f32.partialorder %v2949_v55, %v3141_v21  ;;  %778 = vmin.xlane.f32.xlu0 %v3154_v31  ;;  %vm661_vm4 = vcmp.eq.f32.partialorder %v2960_v7, %v3144_v8 }
 0x31d   :  { %v676_v46 = vsel %vm660_vm3, %v2572_v18, 4  ;;  %v3169_v39 = vcvt.s32.f32 %v790_v25  ;;  %v3171_v5 = vcvt.s32.f32 %v805_v50  ;;  %v677_v55 = vsel %vm661_vm4, %v2572_v18, 4 }
 0x31e   :  { %v3181_v14 = vsel %vm250_vm1, %v676_v46, 2147483647 }
 0x31f   :  { %v3161_v45 = vpop.xlane.xlu1 %637  ;;  %v3164_v43 = vpop.xlane.xlu0 %640  ;;  %793 = vmin.xlane.f32.xlu1 %v3169_v39  ;;  %v820_v40 = vshra.s32 %v3181_v14, 16 }
 0x320   :  { %vm662_vm5 = vcmp.eq.f32.partialorder %v2968_v34, %v3161_v45  ;;  %808 = vmin.xlane.f32.xlu0 %v3171_v5  ;;  %vm663_vm6 = vcmp.eq.f32.partialorder %v2979_v16, %v3164_v43  ;;  %v3192_v34 = vsel %vm250_vm1, %v677_v55, 2147483647 }
 0x321   :  { %v678_v7 = vsel %vm662_vm5, %v2572_v18, 4  ;;  %v3194_v27 = vcvt.s32.f32 %v820_v40  ;;  %v835_v54 = vshra.s32 %v3192_v34, 16  ;;  %v679_v50 = vsel %vm663_vm6, %v2572_v18, 4 }
 0x322   :  { %v3203_v16 = vsel %vm250_vm1, %v678_v7, 2147483647  ;;  %v3218_v7 = vsel %vm250_vm1, %v679_v50, 2147483647 }
 0x323   :  { %v3178_v6 = vpop.xlane.xlu1 %643  ;;  %v3187_v35 = vpop.xlane.xlu0 %646  ;;  %823 = vmin.xlane.f32.xlu1 %v3194_v27  ;;  %v3207_v46 = vcvt.s32.f32 %v835_v54  ;;  %v850_v55 = vshra.s32 %v3203_v16, 16  ;;  %v865_v30 = vshra.s32 %v3218_v7, 16 }
 0x324   :  { %vm664_vm7 = vcmp.eq.f32.partialorder %v2988_v62, %v3178_v6  ;;  %vm665_vm8 = vcmp.eq.f32.partialorder %v2991_v1, %v3187_v35 }
 0x325   :  { %v680_v62 = vsel %vm664_vm7, %v2572_v18, 4  ;;  %v681_v40 = vsel %vm665_vm8, %v2572_v18, 4  ;;  %838 = vmin.xlane.f32.xlu0 %v3207_v46  ;;  %v3214_v44 = vcvt.s32.f32 %v850_v55  ;;  %v3229_v2 = vcvt.s32.f32 %v865_v30  ;;  %v2288_v30 = vld [vmem:[%s4555_s5 + $0x78] sm:$0xff]  }
 0x326   :  { %v3222_v54 = vsel %vm250_vm1, %v680_v62, 2147483647  ;;  %2127 = vmatprep.subr.bf16.mxu0 %v2288_v30  ;;  %v2294_v30 = vld [vmem:[%s4555_s5 + $0x28] sm:$0xff]  }
 0x327   :  { %v3197_v25 = vpop.xlane.xlu1 %649  ;;  %853 = vmin.xlane.f32.xlu1 %v3214_v44  ;;  %v880_v60 = vshra.s32 %v3222_v54, 16 }
 0x328   :  { %vm666_vm9 = vcmp.eq.f32.partialorder %v3002_v41, %v3197_v25  ;;  %v3227_v41 = vsel %vm250_vm1, %v681_v40, 2147483647  ;;  %v2290_v40 = vld [vmem:[%s4555_s5 + $0x80] ss:$0 sps:$4 sm:$0x33]  }
 0x329   :  { %v682_v1 = vsel %vm666_vm9, %v2572_v18, 4  ;;  %v895_v55 = vshra.s32 %v3227_v41, 16  ;;  %v3235_v50 = vcvt.s32.f32 %v880_v60  ;;  %868 = vmin.xlane.f32.xlu0 %v3229_v2  ;;  %v2289_v60 = vld [vmem:[%s4555_s5 + $0x38] sm:$0xff]   ;;  %2278 = vmatprep.subr.msk.bf16.mxu1 %vm1815_vm10, %v2290_v40 }
 0x32a   :  { %v3233_v18 = vsel %vm250_vm1, %v682_v1, 2147483647  ;;  %2128 = vmatpush3.bf16.msra.mxu0 %v2289_v60  ;;  %v1817_v1 = vsel %vm1815_vm10, %v2290_v40, 0  ;;  %v2295_v60 = vld [vmem:[%s4555_s5 + $0x60] sm:$0xff]  }
 0x32b   :  { %v910_v63 = vshra.s32 %v3233_v18, 16  ;;  %v3239_v62 = vcvt.s32.f32 %v895_v55  ;;  %883 = vmin.xlane.f32.xlu1 %v3235_v50  ;;  %v2292_v55 = vld [vmem:[%s4555_s5 + $0x30] sm:$0xff]   ;;  %2253 = vmatpush3.bf16.msra.mxu1 %v1817_v1  ;;  %v2296_v40 = vld [vmem:[%s4555_s5 + $0x20] sm:$0xff]   ;;  %v684_v1 = vand.u32 65535, %v3060_v49 }
 0x32d   :  { %v3242_v23 = vcvt.s32.f32 %v910_v63  ;;  %898 = vmin.xlane.f32.xlu0 %v3239_v62  ;;  %v2291_v63 = vld [vmem:[%s4555_s5 + $0x70] sm:$0xff]  }
 0x32e   :  { %2129 = vmatprep.subr.bf16.mxu0 %v2291_v63  ;;  %v2297_v63 = vld [vmem:[%s4555_s5 + $0x58] sm:$0xff]  }
 0x32f   :  { %913 = vmin.xlane.f32.xlu1 %v3242_v23  ;;  %2130 = vmatpush3.bf16.msra.mxu0 %v2292_v55 }
 0x330   :  { %2131 = vmatprep.subr.bf16.mxu0 %v2293_v33  ;;  %v686_v33 = vcvt.s32.f32 %v684_v1 }
 0x333   :  { %2132 = vmatpush3.bf16.msra.mxu0 %v2294_v30  ;;  %v701_v30 = vcvt.s32.f32 %v699_v11 }
 0x334   :  { %2133 = vmatprep.subr.bf16.mxu0 %v2295_v60  ;;  %v729_v60 = vand.u32 65535, %v3097_v61 }
 0x336   :  { %v731_v19 = vcvt.s32.f32 %v729_v60  ;;  %v789_v60 = vand.u32 65535, %v3149_v58  ;;  %v2298_v58 = vld [vmem:[%s4555_s5 + $0x18] sm:$0xff]  }
 0x337   :  { %2134 = vmatpush3.bf16.msra.mxu0 %v2296_v40 }
 0x338   :  { %2135 = vmatprep.subr.bf16.mxu0 %v2297_v63  ;;  %v716_v63 = vcvt.s32.f32 %v714_v9  ;;  %v759_v9 = vand.u32 65535, %v3125_v47  ;;  %v804_v47 = vand.u32 65535, %v3152_v24  ;;  %v2299_v24 = vld [vmem:[%s4555_s5 + $0x50] sm:$0xff]  }
 0x33b   :  { %2136 = vmatpush3.bf16.msra.mxu0 %v2298_v58  ;;  %v894_v58 = vand.u32 65535, %v3227_v41 }
 0x33c   :  { %2137 = vmatprep.subr.bf16.mxu0 %v2299_v24  ;;  %v2302_v24 = vld [vmem:[%s4555_s5 + $0x8] sm:$0xff]  }
 0x398   :  { %v3277_v55 = vpop.xlane.xlu0 %688 }
 0x399   :  { %vm690_vm11 = vcmp.eq.f32.partialorder %v3073_v59, %v3277_v55  ;;  %v744_v59 = vand.u32 65535, %v3105_v22  ;;  %v774_v22 = vand.u32 65535, %v3133_v29  ;;  %v3313_v29 = vpop.f32.mrf.mxu1 }
 0x39a   :  { %v691_v37 = vsel %vm690_vm11, %v686_v33, inf  ;;  %v761_v33 = vcvt.s32.f32 %v759_v9  ;;  %v834_v9 = vand.u32 65535, %v3192_v34  ;;  %v864_v34 = vand.u32 65535, %v3218_v7 }
 0x39b   :  { %692 = vmin.xlane.f32.xlu0 %v691_v37  ;;  %v746_v61 = vcvt.s32.f32 %v744_v59 }
 0x39c   :  { %v3283_v15 = vpop.xlane.xlu1 %703  ;;  %v3288_v49 = vpop.xlane.xlu0 %718 }
 0x39d   :  { %vm705_vm12 = vcmp.eq.f32.partialorder %v3093_v52, %v3283_v15  ;;  %vm720_vm13 = vcmp.eq.f32.partialorder %v3110_v48, %v3288_v49 }
 0x39e   :  { %v706_v40 = vsel %vm705_vm12, %v701_v30, inf  ;;  %v721_v37 = vsel %vm720_vm13, %v716_v63, inf }
 0x39f   :  { %707 = vmin.xlane.f32.xlu1 %v706_v40  ;;  %722 = vmin.xlane.f32.xlu0 %v721_v37  ;;  %v791_v37 = vcvt.s32.f32 %v789_v60  ;;  %v836_v60 = vcvt.s32.f32 %v834_v9 }
 0x3a0   :  { %v3293_v57 = vpop.xlane.xlu1 %733  ;;  %v3297_v11 = vpop.xlane.xlu0 %748 }
 0x3a1   :  { %vm735_vm14 = vcmp.eq.f32.partialorder %v3117_v28, %v3293_v57  ;;  %vm750_vm15 = vcmp.eq.f32.partialorder %v3130_v38, %v3297_v11  ;;  %v776_v28 = vcvt.s32.f32 %v774_v22 }
 0x3a2   :  { %v736_v52 = vsel %vm735_vm14, %v731_v19, inf  ;;  %v751_v48 = vsel %vm750_vm15, %v746_v61, inf  ;;  %v3330_v61 = vpop.f32.mrf.mxu1 }
 0x3a3   :  { %737 = vmin.xlane.f32.xlu1 %v736_v52  ;;  %752 = vmin.xlane.f32.xlu0 %v751_v48  ;;  %v819_v52 = vand.u32 65535, %v3181_v14 }
 0x3a4   :  { %v3303_v1 = vpop.xlane.xlu1 %763 }
 0x3a5   :  { %v3305_v30 = vpop.xlane.xlu0 %778  ;;  %vm765_vm2 = vcmp.eq.f32.partialorder %v3146_v13, %v3303_v1  ;;  %v806_v13 = vcvt.s32.f32 %v804_v47  ;;  %v821_v48 = vcvt.s32.f32 %v819_v52 }
 0x3a6   :  { %v766_v40 = vsel %vm765_vm2, %v761_v33, inf  ;;  %vm780_vm3 = vcmp.eq.f32.partialorder %v3154_v31, %v3305_v30  ;;  %v3336_v33 = vpop.f32.mrf.mxu1 }
 0x3a7   :  { %767 = vmin.xlane.f32.xlu1 %v766_v40  ;;  %v781_v38 = vsel %vm780_vm3, %v776_v28, inf }
 0x3a8   :  { %782 = vmin.xlane.f32.xlu0 %v781_v38  ;;  %v3315_v63 = vpop.xlane.xlu1 %793  ;;  %v879_v38 = vand.u32 65535, %v3222_v54  ;;  %v2303_v54 = vld [vmem:[%s4555_s5 + $0x40] sm:$0xff]  }
 0x3a9   :  { %v3317_v59 = vpop.xlane.xlu0 %808  ;;  %vm795_vm4 = vcmp.eq.f32.partialorder %v3169_v39, %v3315_v63  ;;  %v849_v39 = vand.u32 65535, %v3203_v16  ;;  %v2301_v16 = vld [vmem:[%s4555_s5 + $0x48] sm:$0xff]  }
 0x3aa   :  { %vm810_vm5 = vcmp.eq.f32.partialorder %v3171_v5, %v3317_v59  ;;  %v796_v31 = vsel %vm795_vm4, %v791_v37, inf  ;;  %v2300_v5 = vld [vmem:[%s4555_s5 + $0x10] sm:$0xff]   ;;  %v3354_v37 = vpop.f32.mrf.mxu1 }
 0x3ab   :  { %v811_v19 = vsel %vm810_vm5, %v806_v13, inf  ;;  %797 = vmin.xlane.f32.xlu1 %v796_v31  ;;  %2138 = vmatpush3.bf16.msra.mxu0 %v2300_v5  ;;  %v851_v40 = vcvt.s32.f32 %v849_v39  ;;  %v866_v13 = vcvt.s32.f32 %v864_v34  ;;  %v881_v31 = vcvt.s32.f32 %v879_v38 }
 0x3ac   :  { %812 = vmin.xlane.f32.xlu0 %v811_v19  ;;  %v3333_v22 = vpop.xlane.xlu1 %823  ;;  %2139 = vmatprep.subr.bf16.mxu0 %v2301_v16  ;;  %v909_v19 = vand.u32 65535, %v3233_v18  ;;  %v3372_v52 = vpop.f32.mrf.mxu1  ;;  %v896_v39 = vcvt.s32.f32 %v894_v58  ;;  %v4727_v58 = vld [vmem:[#allocation7_spill] sm:$0xff] }
 0x3ad   :  { %vm825_vm6 = vcmp.eq.f32.partialorder %v3194_v27, %v3333_v22 }
 0x3ae   :  { %v3343_v14 = vpop.xlane.xlu0 %838  ;;  %v826_v28 = vsel %vm825_vm6, %v821_v48, inf  ;;  %v911_v18 = vcvt.s32.f32 %v909_v19  ;;  %v3382_v5 = vpop.f32.mrf.mxu1 }
 0x3af   :  { %827 = vmin.xlane.f32.xlu1 %v826_v28  ;;  %vm840_vm7 = vcmp.eq.f32.partialorder %v3207_v46, %v3343_v14  ;;  %2140 = vmatpush3.bf16.msra.mxu0 %v2302_v24  ;;  %v925_v24 = vsub.f32 %v3065_v56, %v4727_v58 }
 0x3b0   :  { %v841_v27 = vsel %vm840_vm7, %v836_v60, inf  ;;  %v3351_v47 = vpop.xlane.xlu1 %853  ;;  %2141 = vmatprep.subr.bf16.mxu0 %v2303_v54  ;;  %v3389_v34 = vpop.f32.mrf.mxu1  ;;  %v4728_v54 = vld [vmem:[#allocation9_spill] sm:$0xff] }
 0x3b1   :  { %842 = vmin.xlane.f32.xlu0 %v841_v27  ;;  %vm855_vm8 = vcmp.eq.f32.partialorder %v3214_v44, %v3351_v47 }
 0x3b2   :  { %v856_v46 = vsel %vm855_vm8, %v851_v40, inf  ;;  %v3358_v7 = vpop.xlane.xlu0 %868  ;;  %v4725_v40 = vld [vmem:[#allocation6_spill] sm:$0xff] }
 0x3b3   :  { %857 = vmin.xlane.f32.xlu1 %v856_v46  ;;  %vm870_vm9 = vcmp.eq.f32.partialorder %v3229_v2, %v3358_v7  ;;  %v923_v38 = vsub.f32 %v3054_v12, %v4725_v40 }
 0x3b4   :  { %v3369_v44 = vpop.xlane.xlu1 %883  ;;  %v871_v9 = vsel %vm870_vm9, %v866_v13, inf }
 0x3b5   :  { %vm885_vm10 = vcmp.eq.f32.partialorder %v3235_v50, %v3369_v44  ;;  %872 = vmin.xlane.f32.xlu0 %v871_v9  ;;  %v2304_v50 = vld [vmem:[%s4555_s5] sm:$0xff]   ;;  %v939_v19 = vmul.f32 1.442695, %v923_v38 }
 0x3b6   :  { %v886_v41 = vsel %vm885_vm10, %v881_v31, inf  ;;  %v3376_v48 = vpop.xlane.xlu0 %898  ;;  %2142 = vmatpush3.bf16.msra.mxu0 %v2304_v50  ;;  %v926_v31 = vsub.f32 %v3078_v4, %v4728_v54  ;;  %v4729_v9 = vld [vmem:[#allocation10_spill] sm:$0xff]  ;;  %v943_v50 = vmul.f32 1.442695, %v925_v24 }
 0x3b7   :  { %4723 = vst [vmem:[#allocation2_spill] sm:$0xff] %v3376_v48  ;;  %887 = vmin.xlane.f32.xlu1 %v886_v41  ;;  %vm900_vm11 = vcmp.eq.f32.partialorder %v3239_v62, %v3376_v48  ;;  %v3391_v62 = vpop.f32.mrf.mxu1  ;;  %v927_v41 = vsub.f32 %v3081_v26, %v4729_v9  ;;  %2305 = vpow2.f32 %v939_v19  ;;  %v4733_v38 = vld [vmem:[#allocation14_spill] sm:$0xff]  ;;  %v4735_v9 = vld [vmem:[#allocation16_spill] sm:$0xff] }
 0x3b8   :  { %v3380_v2 = vpop.xlane.xlu1 %913  ;;  %v901_v28 = vsel %vm900_vm11, %v896_v39, inf  ;;  %v945_v40 = vmul.f32 1.442695, %v926_v31  ;;  %v931_v58 = vsub.f32 %v3122_v10, %v4733_v38  ;;  %v4737_v10 = vld [vmem:[#allocation18_spill] sm:$0xff] }
 0x3b9   :  { %4724 = vst [vmem:[#allocation3_spill] sm:$0xff] %v3380_v2  ;;  %vm915_vm12 = vcmp.eq.f32.partialorder %v3242_v23, %v3380_v2  ;;  %902 = vmin.xlane.f32.xlu0 %v901_v28  ;;  %v3393_v16 = vpop.f32.mrf.mxu1  ;;  %v4726_v23 = vld [vmem:[#allocation8_spill] sm:$0xff]  ;;  %v947_v4 = vmul.f32 1.442695, %v927_v41 }
 0x3ba   :  { %v916_v60 = vsel %vm915_vm12, %v911_v18, inf  ;;  %v924_v46 = vsub.f32 %v3063_v42, %v4726_v23  ;;  %v4730_v18 = vld [vmem:[#allocation11_spill] sm:$0xff]  ;;  %v4731_v42 = vld [vmem:[#allocation12_spill] sm:$0xff]  ;;  %v4732_v23 = vld [vmem:[#allocation13_spill] sm:$0xff]  ;;  %v955_v41 = vmul.f32 1.442695, %v931_v58 }
 0x3bb   :  { %917 = vmin.xlane.f32.xlu1 %v916_v60  ;;  %v3395_v27 = vpop.f32.mrf.mxu1  ;;  %v928_v28 = vsub.f32 %v3099_v0, %v4730_v18  ;;  %v929_v60 = vsub.f32 %v3101_v3, %v4731_v42  ;;  %v930_v56 = vsub.f32 %v3120_v53, %v4732_v23  ;;  %v933_v3 = vsub.f32 %v3144_v8, %v4735_v9  ;;  %v4736_v53 = vld [vmem:[#allocation17_spill] sm:$0xff]  ;;  %v4739_v8 = vld [vmem:[#allocation20_spill] sm:$0xff] }
 0x3bc   :  { %v941_v39 = vmul.f32 1.442695, %v924_v46  ;;  %v4734_v46 = vld [vmem:[#allocation15_spill] sm:$0xff]  ;;  %v934_v19 = vsub.f32 %v3161_v45, %v4736_v53  ;;  %v4740_v45 = vld [vmem:[#allocation21_spill] sm:$0xff] }
 0x3bd   :  { %v3401_v13 = vpop.f32.mrf.mxu1  ;;  %v949_v26 = vmul.f32 1.442695, %v928_v28  ;;  %v932_v0 = vsub.f32 %v3141_v21, %v4734_v46  ;;  %v951_v24 = vmul.f32 1.442695, %v929_v60  ;;  %v953_v31 = vmul.f32 1.442695, %v930_v56 }
 0x3be   :  { %2307 = vpow2.f32 %v941_v39  ;;  %v935_v39 = vsub.f32 %v3164_v43, %v4737_v10  ;;  %v4738_v21 = vld [vmem:[#allocation19_spill] sm:$0xff]  ;;  %v959_v42 = vmul.f32 1.442695, %v933_v3  ;;  %v937_v60 = vsub.f32 %v3187_v35, %v4739_v8 }
 0x3bf   :  { %v3411_v12 = vpop.f32.mrf.mxu1  ;;  %2309 = vpow2.f32 %v943_v50  ;;  %v957_v18 = vmul.f32 1.442695, %v932_v0  ;;  %v936_v28 = vsub.f32 %v3178_v6, %v4738_v21  ;;  %v938_v23 = vsub.f32 %v3197_v25, %v4740_v45 }
 0x3c0   :  { %2311 = vpow2.f32 %v945_v40  ;;  %v961_v40 = vmul.f32 1.442695, %v934_v19  ;;  %v963_v56 = vmul.f32 1.442695, %v935_v39  ;;  %v967_v6 = vmul.f32 1.442695, %v937_v60 }
 0x3c1   :  { %v3421_v54 = vpop.f32.mrf.mxu1  ;;  %2313 = vpow2.f32 %v947_v4  ;;  %v965_v43 = vmul.f32 1.442695, %v936_v28  ;;  %v969_v38 = vmul.f32 1.442695, %v938_v23 }
 0x3c2   :  { %2315 = vpow2.f32 %v949_v26 }
 0x3c3   :  { %v3431_v50 = vpop.f32.mrf.mxu1  ;;  %2317 = vpow2.f32 %v951_v24  ;;  %v3441_v24 = vpop.f32.mrf.mxu0 }
 0x3c4   :  { %2319 = vpow2.f32 %v953_v31  ;;  %v2306_v58 = vpop.eup %2305 }
 0x3c5   :  { %2321 = vpow2.f32 %v955_v41  ;;  %v3437_v4 = vpop.f32.mrf.mxu1  ;;  %v971_v0 = vadd.f32 1.0, %v2306_v58  ;;  %v3445_v21 = vpop.f32.mrf.mxu0 }
 0x3c6   :  { %2323 = vpow2.f32 %v957_v18 }
 0x3c7   :  { %2325 = vpow2.f32 %v959_v42  ;;  %v3439_v26 = vpop.f32.mrf.mxu1 }
 0x3c8   :  { %2327 = vpow2.f32 %v961_v40 }
 0x3c9   :  { %2329 = vpow2.f32 %v963_v56  ;;  %v3443_v31 = vpop.f32.mrf.mxu1 }
 0x3ca   :  { %2331 = vpow2.f32 %v965_v43 }
 0x3cb   :  { %v2308_v35 = vpop.eup %2307  ;;  %2333 = vpow2.f32 %v967_v6  ;;  %v3447_v8 = vpop.f32.mrf.mxu1 }
 0x3cc   :  { %v2310_v46 = vpop.eup %2309  ;;  %2335 = vpow2.f32 %v969_v38  ;;  %v972_v3 = vadd.f32 1.0, %v2308_v35  ;;  %v3449_v6 = vpop.f32.mrf.mxu0 }
 0x3cd   :  { %v2312_v25 = vpop.eup %2311  ;;  %v973_v19 = vadd.f32 1.0, %v2310_v46  ;;  %2337 = vrcp.f32 %v971_v0  ;;  %v3451_v35 = vpop.f32.mrf.mxu1 }
 0x3ce   :  { %v2314_v9 = vpop.eup %2313  ;;  %v974_v10 = vadd.f32 1.0, %v2312_v25  ;;  %2339 = vrcp.f32 %v972_v3 }
 0x3cf   :  { %v2316_v53 = vpop.eup %2315  ;;  %v975_v18 = vadd.f32 1.0, %v2314_v9  ;;  %2341 = vrcp.f32 %v973_v19  ;;  %v3453_v19 = vpop.f32.mrf.mxu0 }
 0x3d0   :  { %v2318_v41 = vpop.eup %2317  ;;  %v976_v42 = vadd.f32 1.0, %v2316_v53  ;;  %2343 = vrcp.f32 %v974_v10  ;;  %v3455_v10 = vpop.f32.mrf.mxu1 }
 0x3d1   :  { %v2320_v39 = vpop.eup %2319  ;;  %v977_v40 = vadd.f32 1.0, %v2318_v41  ;;  %2345 = vrcp.f32 %v975_v18  ;;  %4741 = vst [vmem:[#allocation4_spill] sm:$0xff] %v3455_v10 }
 0x3d2   :  { %v2322_v28 = vpop.eup %2321  ;;  %v978_v23 = vadd.f32 1.0, %v2320_v39  ;;  %2347 = vrcp.f32 %v976_v42 }
 0x3d3   :  { %v2324_v60 = vpop.eup %2323  ;;  %v979_v43 = vadd.f32 1.0, %v2322_v28  ;;  %2349 = vrcp.f32 %v977_v40  ;;  %v3457_v28 = vpop.f32.mrf.mxu0 }
 0x3d4   :  { %v2326_v45 = vpop.eup %2325  ;;  %v980_v58 = vadd.f32 1.0, %v2324_v60  ;;  %2351 = vrcp.f32 %v978_v23  ;;  %4742 = vst [vmem:[#allocation5_spill] sm:$0xff] %v3457_v28  ;;  %v3461_v60 = vpop.f32.mrf.mxu1  ;;  %v4747_v23 = vlaneseq }
 0x3d5   :  { %v2328_v56 = vpop.eup %2327  ;;  %v981_v25 = vadd.f32 1.0, %v2326_v45  ;;  %2353 = vrcp.f32 %v979_v43  ;;  %4744 = vst [vmem:[#allocation8_spill] sm:$0xff] %v3461_v60 }
 0x3d6   :  { %v2330_v38 = vpop.eup %2329  ;;  %v982_v9 = vadd.f32 1.0, %v2328_v56  ;;  %2355 = vrcp.f32 %v980_v58  ;;  %v3468_v56 = vshrl.u32 %v4747_v23, 7 }
 0x3d7   :  { %v2332_v46 = vpop.eup %2331  ;;  %v983_v53 = vadd.f32 1.0, %v2330_v38  ;;  %2357 = vrcp.f32 %v981_v25  ;;  %v3472_v38 = vpop.f32.mrf.mxu0 }
 0x3d8   :  { %v2334_v0 = vpop.eup %2333  ;;  %v984_v41 = vadd.f32 1.0, %v2332_v46  ;;  %2359 = vrcp.f32 %v982_v9  ;;  %4749 = vst [vmem:[#allocation11_spill] sm:$0xff] %v3472_v38  ;;  %v3476_v46 = vpop.f32.mrf.mxu1  ;;  %v1055_v9 = vsub.s32 0, %v3468_v56 }
 0x3d9   :  { %v2336_v3 = vpop.eup %2335  ;;  %v985_v39 = vadd.f32 1.0, %v2334_v0  ;;  %2361 = vrcp.f32 %v983_v53  ;;  %4751 = vst [vmem:[#allocation13_spill] sm:$0xff] %v3476_v46  ;;  %v1382_v53 = vld [vmem:[%s4556_s6] sm:$0x7]  ;;  %v3495_v23 = vpop.f32.mrf.mxu0 }
 0x3da   :  { %v986_v18 = vadd.f32 1.0, %v2336_v3  ;;  %v3459_v42 = vpop.eup %2337  ;;  %2363 = vrcp.f32 %v984_v41  ;;  %4755 = vst [vmem:[#allocation17_spill] sm:$0xff] %v3495_v23  ;;  %v3499_v32 = vpop.f32.mrf.mxu1  ;;  %v3505_v20 = vrot.slane %v1382_v53, %v1055_v9  ;;  %v4762_v23 = vsub.s32 2, %v3468_v56 }
 0x3db   :  { %4743 = vst [vmem:[#allocation6_spill] sm:$0xff] %v3459_v42  ;;  %v3463_v40 = vpop.eup %2339  ;;  %2365 = vrcp.f32 %v985_v39  ;;  %v3492_v39 = vld [vmem:[%s4557_s4] sm:$0x7]  ;;  %4757 = vst [vmem:[#allocation19_spill] sm:$0xff] %v3499_v32  ;;  %v3522_v32 = vsub.f32 1.0, %v3459_v42 }
 0x3dc   :  { %4745 = vst [vmem:[#allocation7_spill] sm:$0xff] %v3463_v40  ;;  %v3465_v45 = vpop.eup %2341  ;;  %2367 = vrcp.f32 %v986_v18  ;;  %v1059_v18 = vsub.s32 1, %v3468_v56  ;;  %4760 = vst [vmem:[#allocation38_spill] sm:$0xff] %v3505_v20  ;;  %v3508_v41 = vrot.slane %v3492_v39, %v1055_v9  ;;  %v3517_v2 = vrot.slane %v1382_v53, %v4762_v23  ;;  %v3527_v20 = vpop.f32.mrf.mxu0 }
 0x3dd   :  { %4746 = vst [vmem:[#allocation9_spill] sm:$0xff] %v3465_v45  ;;  %v3470_v43 = vpop.eup %2343  ;;  %v3525_v38 = vsub.f32 1.0, %v3463_v40  ;;  %v3532_v10 = vsub.f32 1.0, %v3465_v45 }
 0x3de   :  { %4748 = vst [vmem:[#allocation10_spill] sm:$0xff] %v3470_v43  ;;  %v3474_v58 = vpop.eup %2345  ;;  %v3511_v46 = vrot.slane %v3492_v39, %v1059_v18  ;;  %v3519_v48 = vrot.slane %v1382_v53, %v1059_v18  ;;  %v3535_v28 = vsub.f32 1.0, %v3470_v43  ;;  %v3543_v18 = vpop.f32.mrf.mxu1 }
 0x3df   :  { %4750 = vst [vmem:[#allocation12_spill] sm:$0xff] %v3474_v58  ;;  %v3478_v25 = vpop.eup %2347  ;;  %4763 = vst [vmem:[#allocation40_spill] sm:$0xff] %v3525_v38  ;;  %v3538_v23 = vsub.f32 1.0, %v3474_v58 }
 0x3e0   :  { %4752 = vst [vmem:[#allocation14_spill] sm:$0xff] %v3478_v25  ;;  %v3480_v0 = vpop.eup %2349  ;;  %v3541_v53 = vsub.f32 1.0, %v3478_v25  ;;  %v3563_v25 = vadd.f32 %v3313_v29, %v3508_v41  ;;  %v3583_v29 = vadd.f32 %v3354_v37, %v3511_v46  ;;  %v3605_v37 = vadd.f32 %v3391_v62, %v3511_v46 }
 0x3e1   :  { %4753 = vst [vmem:[#allocation15_spill] sm:$0xff] %v3480_v0  ;;  %v3483_v3 = vpop.eup %2351  ;;  %v3548_v38 = vsub.f32 1.0, %v3480_v0  ;;  %v3624_v62 = vadd.f32 %v3395_v27, %v3511_v46  ;;  %v3654_v27 = vadd.f32 %v3411_v12, %v3511_v46  ;;  %v785_v12 = vcvt.f32.s32 %v3305_v30 }
 0x3e2   :  { %4754 = vst [vmem:[#allocation16_spill] sm:$0xff] %v3483_v3  ;;  %v3497_v51 = vpop.eup %2353  ;;  %4765 = vst [vmem:[#allocation42_spill] sm:$0xff] %v3541_v53  ;;  %v3551_v42 = vsub.f32 1.0, %v3483_v3  ;;  %v3567_v53 = vadd.f32 %v3330_v61, %v3511_v46  ;;  %v3587_v61 = vadd.f32 %v3372_v52, %v3508_v41  ;;  %v3607_v52 = vpop.f32.mrf.mxu1  ;;  %v3692_v30 = vadd.f32 %v3439_v26, %v3511_v46 }
 0x3e3   :  { %4756 = vst [vmem:[#allocation18_spill] sm:$0xff] %v3497_v51  ;;  %v3501_v17 = vpop.eup %2355  ;;  %v3554_v45 = vsub.f32 1.0, %v3497_v51  ;;  %4779 = vst [vmem:[#allocation56_spill] sm:$0xff] %v3624_v62  ;;  %v3708_v26 = vadd.f32 %v3443_v31, %v3508_v41 }
 0x3e4   :  { %4758 = vst [vmem:[#allocation20_spill] sm:$0xff] %v3501_v17  ;;  %v3503_v36 = vpop.eup %2357  ;;  %v3557_v43 = vsub.f32 1.0, %v3501_v17  ;;  %v3579_v17 = vadd.f32 %v3336_v33, %v3508_v41  ;;  %4773 = vst [vmem:[#allocation50_spill] sm:$0xff] %v3587_v61  ;;  %v3601_v33 = vadd.f32 %v3389_v34, %v3508_v41 }
 0x3e5   :  { %4759 = vst [vmem:[#allocation21_spill] sm:$0xff] %v3503_v36  ;;  %v3513_v60 = vpop.eup %2359  ;;  %4767 = vst [vmem:[#allocation44_spill] sm:$0xff] %v3554_v45  ;;  %v3570_v0 = vsub.f32 1.0, %v3503_v36 }
 0x3e6   :  { %4761 = vst [vmem:[#allocation39_spill] sm:$0xff] %v3513_v60  ;;  %v3529_v9 = vpop.eup %2361  ;;  %4768 = vst [vmem:[#allocation45_spill] sm:$0xff] %v3557_v43  ;;  %v3573_v3 = vsub.f32 1.0, %v3513_v60  ;;  %v3589_v43 = vpop.f32.mrf.mxu0  ;;  %v695_v60 = vcvt.f32.s32 %v3277_v55 }
 0x3e7   :  { %4764 = vst [vmem:[#allocation41_spill] sm:$0xff] %v3529_v9  ;;  %v3545_v40 = vpop.eup %2363  ;;  %4770 = vst [vmem:[#allocation47_spill] sm:$0xff] %v3570_v0  ;;  %v3592_v36 = vsub.f32 1.0, %v3529_v9  ;;  %v710_v0 = vcvt.f32.s32 %v3283_v15  ;;  %v3612_v9 = vadd.f32 %v3393_v16, %v3508_v41  ;;  %v725_v16 = vcvt.f32.s32 %v3288_v49 }
 0x3e8   :  { %4766 = vst [vmem:[#allocation43_spill] sm:$0xff] %v3545_v40  ;;  %v3559_v58 = vpop.eup %2365  ;;  %4771 = vst [vmem:[#allocation48_spill] sm:$0xff] %v3573_v3  ;;  %v3597_v3 = vadd.f32 %v3382_v5, %v3511_v46  ;;  %v3615_v55 = vsub.f32 1.0, %v3545_v40  ;;  %v3635_v34 = vshll.u32 %v695_v60, 16  ;;  %v740_v49 = vcvt.f32.s32 %v3293_v57 }
 0x3e9   :  { %4769 = vst [vmem:[#allocation46_spill] sm:$0xff] %v3559_v58  ;;  %v3575_v51 = vpop.eup %2367  ;;  %4774 = vst [vmem:[#allocation51_spill] sm:$0xff] %v3592_v36  ;;  %v3618_v5 = vsub.f32 1.0, %v3559_v58  ;;  %v3648_v58 = vadd.f32 %v3401_v13, %v3508_v41  ;;  %v755_v60 = vcvt.f32.s32 %v3297_v11  ;;  %v3661_v57 = vshll.u32 %v725_v16, 16  ;;  %v4791_v16 = vld [vmem:[#allocation5_spill] sm:$0xff] }
 0x3ea   :  { %4772 = vst [vmem:[#allocation49_spill] sm:$0xff] %v3575_v51  ;;  %4775 = vst [vmem:[#allocation52_spill] sm:$0xff] %v3601_v33  ;;  %v3627_v15 = vsub.f32 1.0, %v3575_v51  ;;  %v3640_v51 = vpop.f32.mrf.mxu1  ;;  %v770_v40 = vcvt.f32.s32 %v3303_v1  ;;  %v3666_v13 = vadd.f32 %v3421_v54, %v3508_v41  ;;  %v3670_v11 = vadd.f32 %v3431_v50, %v3511_v46 }
 0x3eb   :  { %4776 = vst [vmem:[#allocation53_spill] sm:$0xff] %v3612_v9  ;;  %4777 = vst [vmem:[#allocation54_spill] sm:$0xff] %v3615_v55  ;;  %v4783_v55 = vsub.s32 2, %v3468_v56  ;;  %v800_v56 = vcvt.f32.s32 %v3315_v63  ;;  %v3683_v54 = vshll.u32 %v740_v49, 16  ;;  %v3694_v63 = vshll.u32 %v755_v60, 16 }
 0x3ec   :  { %4778 = vst [vmem:[#allocation55_spill] sm:$0xff] %v3618_v5  ;;  %4780 = vst [vmem:[#allocation57_spill] sm:$0xff] %v3627_v15  ;;  %v3633_v5 = vpop.f32.mrf.mxu0  ;;  %v3642_v15 = vshll.u32 %v710_v0, 16  ;;  %v3681_v1 = vpop.f32.mrf.mxu1  ;;  %v3702_v45 = vshll.u32 %v770_v40, 16  ;;  %v845_v40 = vcvt.f32.s32 %v3343_v14  ;;  %v875_v14 = vcvt.f32.s32 %v3358_v7 }
 0x3ed   :  { %4781 = vst [vmem:[#allocation58_spill] sm:$0xff] %v3648_v58  ;;  %4782 = vst [vmem:[#allocation59_spill] sm:$0xff] %v3654_v27  ;;  %v3659_v0 = vrot.slane %v3492_v39, %v4783_v55  ;;  %v815_v39 = vcvt.f32.s32 %v3317_v59  ;;  %v3679_v55 = vadd.f32 %v3437_v4, %v3508_v41  ;;  %v830_v59 = vcvt.f32.s32 %v3333_v22 }
 0x3ee   :  { %4784 = vst [vmem:[#allocation60_spill] sm:$0xff] %v3666_v13  ;;  %4785 = vst [vmem:[#allocation61_spill] sm:$0xff] %v3670_v11  ;;  %v3672_v36 = vpop.f32.mrf.mxu0  ;;  %v3710_v58 = vshll.u32 %v785_v12, 16  ;;  %v3712_v22 = vshll.u32 %v800_v56, 16  ;;  %v1224_v9 = vpop.f32.mrf.mxu1  ;;  %v860_v12 = vcvt.f32.s32 %v3351_v47  ;;  %v890_v47 = vcvt.f32.s32 %v3369_v44  ;;  %v4797_v11 = vld [vmem:[#allocation3_spill] sm:$0xff]  ;;  %v4803_v44 = vld [vmem:[#allocation13_spill] sm:$0xff] }
 0x3ef   :  { %4786 = vst [vmem:[#allocation62_spill] sm:$0xff] %v3679_v55  ;;  %v3688_v50 = vadd.f32 %v3441_v24, %v3659_v0  ;;  %4787 = vst [vmem:[#allocation63_spill] sm:$0xff] %v3692_v30  ;;  %v3700_v49 = vadd.f32 %v3445_v21, %v3659_v0  ;;  %v3714_v4 = vshll.u32 %v815_v39, 16  ;;  %v3722_v31 = vadd.f32 %v3449_v6, %v3659_v0  ;;  %v4794_v21 = vld [vmem:[#allocation11_spill] sm:$0xff] }
 0x3f0   :  { %4788 = vst [vmem:[#allocation64_spill] sm:$0xff] %v3708_v26  ;;  %v1306_v60 = vpop.f32.mrf.mxu0  ;;  %v3724_v13 = vshll.u32 %v830_v59, 16  ;;  %v3730_v39 = vadd.f32 %v3447_v8, %v3511_v46  ;;  %v3736_v24 = vadd.f32 %v3453_v19, %v3659_v0  ;;  %v3740_v6 = vadd.f32 %v3451_v35, %v3508_v41  ;;  %v4792_v8 = vld [vmem:[#allocation4_spill] sm:$0xff]  ;;  %v1228_v19 = vpop.f32.mrf.mxu1  ;;  %v4796_v35 = vld [vmem:[#allocation2_spill] sm:$0xff] }
 0x3f1   :  { %v3745_v56 = vadd.f32 %v4791_v16, %v3659_v0  ;;  %v3749_v7 = vadd.f32 %v4792_v8, %v3511_v46  ;;  %v3753_v26 = vadd.f32 %v4794_v21, %v3659_v0  ;;  %v3755_v55 = vshll.u32 %v845_v40, 16  ;;  %v4799_v8 = vld [vmem:[#allocation8_spill] sm:$0xff]  ;;  %v4801_v21 = vld [vmem:[#allocation17_spill] sm:$0xff] }
 0x3f2   :  { %4789 = vst [vmem:[#allocation65_spill] sm:$0xff] %v3730_v39  ;;  %4790 = vst [vmem:[#allocation66_spill] sm:$0xff] %v3740_v6  ;;  %v2250_v59 = vpop.f32.mrf.mxu0  ;;  %v905_v30 = vcvt.f32.s32 %v4796_v35  ;;  %v920_v27 = vcvt.f32.s32 %v4797_v11  ;;  %v3760_v62 = vshll.u32 %v860_v12, 16  ;;  %v3765_v33 = vadd.f32 %v4799_v8, %v3508_v41  ;;  %v4812_v8 = vld [vmem:[#allocation22_spill] sm:$0xff] }
 0x3f3   :  { %4793 = vst [vmem:[#allocation5_spill] sm:$0xff] %v3749_v7  ;;  %4795 = vst [vmem:[#allocation4_spill] sm:$0xff] %v3755_v55  ;;  %v3769_v61 = vadd.f32 %v4801_v21, %v3659_v0  ;;  %v3771_v40 = vshll.u32 %v875_v14, 16  ;;  %v3777_v12 = vadd.f32 %v4803_v44, %v3511_v46  ;;  %v3779_v16 = vshll.u32 %v890_v47, 16  ;;  %v1230_v55 = vpop.f32.mrf.mxu1  ;;  %v4807_v44 = vld [vmem:[#allocation19_spill] sm:$0xff]  ;;  %v4813_v21 = vld [vmem:[#allocation38_spill] sm:$0xff] }
 0x3f4   :  { %4798 = vst [vmem:[#allocation11_spill] sm:$0xff] %v3760_v62  ;;  %4800 = vst [vmem:[#allocation2_spill] sm:$0xff] %v3765_v33  ;;  %v1319_v62 = vpop.f32.mrf.mxu0  ;;  %v3784_v14 = vshll.u32 %v905_v30, 16  ;;  %v3790_v11 = vadd.f32 %v3527_v20, %v3659_v0  ;;  %v3794_v35 = vadd.f32 %v4807_v44, %v3508_v41  ;;  %v3800_v39 = vadd.f32 %v3589_v43, %v3659_v0 }
 0x3f5   :  { %4802 = vst [vmem:[#allocation3_spill] sm:$0xff] %v3771_v40  ;;  %4804 = vst [vmem:[#allocation8_spill] sm:$0xff] %v3777_v12  ;;  %v3786_v40 = vshll.u32 %v920_v27, 16  ;;  %v3804_v27 = vadd.f32 %v3543_v18, %v3511_v46  ;;  %v3809_v20 = vadd.f32 %v3633_v5, %v3659_v0  ;;  %v3813_v44 = vadd.f32 %v3607_v52, %v3508_v41  ;;  %v1232_v30 = vpop.f32.mrf.mxu1  ;;  %v4820_v12 = vld [vmem:[#allocation24_spill] sm:$0xff] }
 0x3f6   :  { %4805 = vst [vmem:[#allocation17_spill] sm:$0xff] %v3784_v14  ;;  %4808 = vst [vmem:[#allocation19_spill] sm:$0xff] %v3794_v35  ;;  %v3817_v47 = vadd.f32 %v3672_v36, %v3659_v0  ;;  %v2251_v43 = vpop.f32.mrf.mxu0  ;;  %vm1395_vm13 = vcmp.eq.s32.totalorder %v4813_v21, %v4812_v8  ;;  %vm1397_vm14 = vcmp.eq.s32.totalorder %v3517_v2, %v4812_v8 }
 0x3f7   :  { %4806 = vst [vmem:[#allocation13_spill] sm:$0xff] %v3786_v40  ;;  %4809 = vst [vmem:[#allocation67_spill] sm:$0xff] %v3800_v39  ;;  %vm1396_vm15 = vcmp.eq.s32.totalorder %v3519_v48, %v4812_v8  ;;  %v3827_v18 = vadd.f32 %v3640_v51, %v3511_v46  ;;  %v3830_v52 = vadd.f32 %v1306_v60, %v3659_v0  ;;  %v4819_v39 = vld [vmem:[#allocation23_spill] sm:$0xff] }
 0x3f8   :  { %4810 = vst [vmem:[#allocation68_spill] sm:$0xff] %v3804_v27  ;;  %4811 = vst [vmem:[#allocation69_spill] sm:$0xff] %v3813_v44  ;;  %v3834_v36 = vadd.f32 %v3681_v1, %v3508_v41  ;;  %v3837_v5 = vadd.f32 %v2250_v59, %v3659_v0  ;;  %v3842_v6 = vadd.f32 %v1224_v9, %v3511_v46  ;;  %v1234_v27 = vpop.f32.mrf.mxu1  ;;  %v4822_v9 = vld [vmem:[#allocation25_spill] sm:$0xff]  ;;  %v4824_v44 = vmax.f32 %v3700_v49, 0.0 }
 0x3f9   :  { %4814 = vst [vmem:[#allocation22_spill] sm:$0xff] %v3827_v18  ;;  %v3845_v51 = vadd.f32 %v1319_v62, %v3659_v0  ;;  %v3850_v40 = vadd.f32 %v1228_v19, %v3508_v41  ;;  %v3853_v59 = vadd.f32 %v2251_v43, %v3659_v0  ;;  %v1322_v62 = vpop.f32.mrf.mxu0  ;;  %vm1398_vm2 = vcmp.eq.s32.totalorder %v4813_v21, %v4819_v39 }
 0x3fa   :  { %4815 = vst [vmem:[#allocation38_spill] sm:$0xff] %v3834_v36  ;;  %4816 = vst [vmem:[#allocation70_spill] sm:$0xff] %v3837_v5  ;;  %v3868_v35 = vadd.f32 %v1230_v55, %v3511_v46  ;;  %v3873_v1 = vadd.f32 %v1322_v62, %v3659_v0  ;;  %v3876_v19 = vadd.f32 %v1232_v30, %v3508_v41  ;;  %v4821_v62 = vld [vmem:[#allocation6_spill] sm:$0xff] }
 0x3fb   :  { %4817 = vst [vmem:[#allocation71_spill] sm:$0xff] %v3842_v6  ;;  %4818 = vst [vmem:[#allocation72_spill] sm:$0xff] %v3853_v59  ;;  %vm1403_vm3 = vcmp.eq.s32.totalorder %v3517_v2, %v4820_v12  ;;  %vm1400_vm7 = vcmp.eq.s32.totalorder %v3517_v2, %v4819_v39  ;;  %vm1399_vm8 = vcmp.eq.s32.totalorder %v3519_v48, %v4819_v39 }
 0x3fc   :  { %vm1406_vm9 = vcmp.eq.s32.totalorder %v3517_v2, %v4822_v9 }
 0x424   :  { %v693_v60 = vpop.xlane.xlu0 %692 }
 0x425   :  { %v694_v33 = vcvt.f32.s32 %v693_v60 }
 0x427   :  { %v697_v43 = vadd.s32 %v3635_v34, %v694_v33  ;;  %v3886_v34 = vadd.f32 %v1234_v27, %v3511_v46 }
 0x428   :  { %v708_v33 = vpop.xlane.xlu1 %707  ;;  %v723_v27 = vpop.xlane.xlu0 %722 }
 0x429   :  { %vm1443_vm4 = vcmp.eq.s32.totalorder %v4813_v21, %v697_v43  ;;  %vm1444_vm5 = vcmp.eq.s32.totalorder %v3519_v48, %v697_v43  ;;  %vm1445_vm6 = vcmp.eq.s32.totalorder %v3517_v2, %v697_v43  ;;  %v709_v30 = vcvt.f32.s32 %v708_v33 }
 0x42a   :  { %v1491_v0 = vsel %vm1443_vm4, %v3522_v32, 0.0  ;;  %v1492_v41 = vsel %vm1444_vm5, %v3522_v32, 0.0  ;;  %v1493_v55 = vsel %vm1445_vm6, %v3522_v32, 0.0  ;;  %v724_v7 = vcvt.f32.s32 %v723_v27  ;;  %v4827_v27 = vld [vmem:[#allocation26_spill] sm:$0xff] }
 0x42b   :  { %v1539_v43 = vsel %vm1395_vm13, %v4821_v62, %v1491_v0  ;;  %v1541_v46 = vsel %vm1397_vm14, %v4821_v62, %v1493_v55  ;;  %v1540_v32 = vsel %vm1396_vm15, %v4821_v62, %v1492_v41  ;;  %v712_v60 = vadd.s32 %v3642_v15, %v709_v30  ;;  %v4826_v30 = vld [vmem:[#allocation40_spill] sm:$0xff] }
 0x42c   :  { %v4823_v55 = vmax.f32 %v3563_v25, 0.0  ;;  %v1589_v8 = vmul.f32 %v1541_v46, %v4824_v44  ;;  %v738_v41 = vpop.xlane.xlu1 %737  ;;  %v4825_v62 = vmax.f32 %v3567_v53, 0.0  ;;  %v727_v25 = vadd.s32 %v3661_v57, %v724_v7  ;;  %v753_v53 = vpop.xlane.xlu0 %752 }
 0x42d   :  { %vm1446_vm10 = vcmp.eq.s32.totalorder %v4813_v21, %v712_v60  ;;  %vm1447_vm11 = vcmp.eq.s32.totalorder %v3519_v48, %v712_v60  ;;  %vm1448_vm12 = vcmp.eq.s32.totalorder %v3517_v2, %v712_v60  ;;  %v739_v46 = vcvt.f32.s32 %v738_v41 }
 0x42e   :  { %v3913_v36 = vmul.f32 %v1539_v43, %v4823_v55  ;;  %v3919_v33 = vmul.f32 %v1540_v32, %v4825_v62  ;;  %v1494_v43 = vsel %vm1446_vm10, %v4826_v30, 0.0  ;;  %v1495_v49 = vsel %vm1447_vm11, %v4826_v30, 0.0  ;;  %v4828_v32 = vld [vmem:[#allocation7_spill] sm:$0xff] }
 0x42f   :  { %v1496_v44 = vsel %vm1448_vm12, %v4826_v30, 0.0  ;;  %vm1409_vm13 = vcmp.eq.s32.totalorder %v3517_v2, %v4827_v27  ;;  %v1542_v55 = vsel %vm1398_vm2, %v4828_v32, %v1494_v43  ;;  %vm1449_vm14 = vcmp.eq.s32.totalorder %v4813_v21, %v727_v25  ;;  %v4830_v30 = vld [vmem:[#allocation9_spill] sm:$0xff] }
 0x430   :  { %vm1450_vm15 = vcmp.eq.s32.totalorder %v3519_v48, %v727_v25  ;;  %vm1451_vm4 = vcmp.eq.s32.totalorder %v3517_v2, %v727_v25  ;;  %v4829_v57 = vmax.f32 %v3579_v17, 0.0  ;;  %v3943_v60 = vsel %vm1449_vm14, %v3532_v10, 0.0  ;;  %v768_v14 = vpop.xlane.xlu1 %767 }
 0x431   :  { %v1498_v41 = vsel %vm1450_vm15, %v3532_v10, 0.0  ;;  %v1499_v62 = vsel %vm1451_vm4, %v3532_v10, 0.0  ;;  %vm1402_vm2 = vcmp.eq.s32.totalorder %v3519_v48, %v4820_v12  ;;  %v1544_v17 = vsel %vm1400_vm7, %v4828_v32, %v1496_v44 }
 0x432   :  { %v3940_v7 = vmul.f32 %v1542_v55, %v4829_v57  ;;  %v1547_v43 = vsel %vm1403_vm3, %v4830_v30, %v1499_v62  ;;  %v742_v25 = vadd.s32 %v3683_v54, %v739_v46  ;;  %v754_v55 = vcvt.f32.s32 %v753_v53 }
 0x433   :  { %vm1405_vm5 = vcmp.eq.s32.totalorder %v3519_v48, %v4822_v9  ;;  %v4831_v10 = vmax.f32 %v3688_v50, 0.0  ;;  %v4832_v15 = vmax.f32 %v3736_v24, 0.0  ;;  %v1543_v62 = vsel %vm1399_vm8, %v4828_v32, %v1495_v49  ;;  %v783_v50 = vpop.xlane.xlu0 %782  ;;  %v4833_v49 = vld [vmem:[#allocation28_spill] sm:$0xff] }
 0x434   :  { %v1635_v44 = vpack.c.bf16 %v3940_v7, %v3913_v36  ;;  %vm1452_vm3 = vcmp.eq.s32.totalorder %v4813_v21, %v742_v25  ;;  %vm1453_vm6 = vcmp.eq.s32.totalorder %v3519_v48, %v742_v25  ;;  %vm1454_vm7 = vcmp.eq.s32.totalorder %v3517_v2, %v742_v25  ;;  %v4834_v36 = vld [vmem:[#allocation10_spill] sm:$0xff] }
 0x435   :  { %v1595_v57 = vmul.f32 %v1547_v43, %v4831_v10  ;;  %v1592_v0 = vmul.f32 %v1544_v17, %v4832_v15  ;;  %v757_v54 = vadd.s32 %v3694_v63, %v754_v55  ;;  %v3975_v15 = vsel %vm1452_vm3, %v3535_v28, 0.0  ;;  %v4835_v63 = vld [vmem:[#allocation27_spill] sm:$0xff]  ;;  %v4837_v43 = vld [vmem:[#allocation12_spill] sm:$0xff]  ;;  %v798_v10 = vpop.xlane.xlu1 %797 }
 0x436   :  { %v1501_v46 = vsel %vm1453_vm6, %v3535_v28, 0.0  ;;  %v1502_v39 = vsel %vm1454_vm7, %v3535_v28, 0.0  ;;  %vm1415_vm8 = vcmp.eq.s32.totalorder %v3517_v2, %v4833_v49  ;;  %vm1412_vm14 = vcmp.eq.s32.totalorder %v3517_v2, %v4835_v63 }
 0x437   :  { %v1637_v24 = vpack.c.bf16 %v1592_v0, %v1589_v8  ;;  %v1550_v53 = vsel %vm1406_vm9, %v4834_v36, %v1502_v39  ;;  %vm1455_vm10 = vcmp.eq.s32.totalorder %v4813_v21, %v757_v54  ;;  %vm1456_vm11 = vcmp.eq.s32.totalorder %v3519_v48, %v757_v54  ;;  %v813_v39 = vpop.xlane.xlu0 %812 }
 0x438   :  { %vm1457_vm12 = vcmp.eq.s32.totalorder %v3517_v2, %v757_v54  ;;  %v4836_v0 = vmax.f32 %v3722_v31, 0.0  ;;  %v3993_v8 = vsel %vm1455_vm10, %v3538_v23, 0.0  ;;  %v3996_v32 = vsel %vm1456_vm11, %v3538_v23, 0.0 }
 0x439   :  { %v1505_v7 = vsel %vm1457_vm12, %v3538_v23, 0.0  ;;  %2254 = vmatprep.mubr.msk.bf16.mxu1 %vm250_vm1, %v1637_v24  ;;  %v769_v25 = vcvt.f32.s32 %v768_v14  ;;  %v784_v55 = vcvt.f32.s32 %v783_v50  ;;  %v4838_v31 = vmax.f32 %v3583_v29, 0.0  ;;  %v4841_v50 = vld [vmem:[#allocation30_spill] sm:$0xff] }
 0x43a   :  { %v1598_v28 = vmul.f32 %v1550_v53, %v4836_v0  ;;  %v1553_v17 = vsel %vm1409_vm13, %v4837_v43, %v1505_v7  ;;  %v4839_v53 = vld [vmem:[#allocation29_spill] sm:$0xff]  ;;  %v4840_v23 = vmax.f32 %v3753_v26, 0.0  ;;  %v799_v24 = vcvt.f32.s32 %v798_v10 }
 0x43b   :  { %v1591_v54 = vmul.f32 %v1543_v62, %v4838_v31  ;;  %vm1418_vm9 = vcmp.eq.s32.totalorder %v3517_v2, %v4839_v53  ;;  %v814_v18 = vcvt.f32.s32 %v813_v39  ;;  %v772_v59 = vadd.s32 %v3702_v45, %v769_v25  ;;  %v4845_v25 = vld [vmem:[#allocation14_spill] sm:$0xff]  ;;  %v4847_v39 = vld [vmem:[#allocation32_spill] sm:$0xff] }
 0x43c   :  { %v1640_v0 = vpack.c.bf16 %v1598_v28, %v1595_v57  ;;  %v1601_v6 = vmul.f32 %v1553_v17, %v4840_v23  ;;  %v787_v7 = vadd.s32 %v3710_v58, %v784_v55  ;;  %v1546_v29 = vsel %vm1402_vm2, %v4830_v30, %v1498_v41  ;;  %v4844_v28 = vld [vmem:[#allocation15_spill] sm:$0xff] }
 0x43d   :  { %v1636_v14 = vpack.c.bf16 %v1591_v54, %v3919_v33  ;;  %v802_v62 = vadd.s32 %v3712_v22, %v799_v24  ;;  %v817_v57 = vadd.s32 %v3714_v4, %v814_v18  ;;  %vm1421_vm13 = vcmp.eq.s32.totalorder %v3517_v2, %v4841_v50  ;;  %v843_v54 = vpop.xlane.xlu0 %842  ;;  %v4849_v24 = vld [vmem:[#allocation16_spill] sm:$0xff] }
 0x43e   :  { %v1549_v45 = vsel %vm1405_vm5, %v4834_v36, %v1501_v46  ;;  %v4842_v58 = vmax.f32 %v3597_v3, 0.0  ;;  %2255 = vmatmul.mubr.msk.bf16.vlgmr.msra.gmra.mxu1 %vm250_vm1, %v1640_v0  ;;  %vm1401_vm15 = vcmp.eq.s32.totalorder %v4813_v21, %v4820_v12  ;;  %vm1404_vm4 = vcmp.eq.s32.totalorder %v4813_v21, %v4822_v9  ;;  %v4843_v3 = vld [vmem:[#allocation42_spill] sm:$0xff]  ;;  %v828_v46 = vpop.xlane.xlu1 %827 }
 0x43f   :  { %vm1458_vm2 = vcmp.eq.s32.totalorder %v4813_v21, %v772_v59  ;;  %vm1459_vm3 = vcmp.eq.s32.totalorder %v3519_v48, %v772_v59  ;;  %vm1460_vm6 = vcmp.eq.s32.totalorder %v3517_v2, %v772_v59  ;;  %vm1461_vm5 = vcmp.eq.s32.totalorder %v4813_v21, %v787_v7  ;;  %1851 = vmatprep.mubr.bf16.mxu0 %v1636_v14  ;;  %v4850_v14 = vld [vmem:[#allocation44_spill] sm:$0xff] }
 0x440   :  { %v4027_v26 = vmul.f32 %v1546_v29, %v4842_v58  ;;  %v4039_v4 = vsel %vm1458_vm2, %v4843_v3, 0.0  ;;  %v4042_v22 = vsel %vm1459_vm3, %v4843_v3, 0.0  ;;  %vm1462_vm7 = vcmp.eq.s32.totalorder %v3519_v48, %v787_v7  ;;  %1852 = vmatmul.mubr.bf16.vlgmr.msra.gmra.mxu0 %v1635_v44 }
 0x441   :  { %vm1463_vm10 = vcmp.eq.s32.totalorder %v3517_v2, %v787_v7  ;;  %v4047_v18 = vsel %vm1461_vm5, %v3548_v38, 0.0  ;;  %v4050_v33 = vsel %vm1462_vm7, %v3548_v38, 0.0  ;;  %v1508_v41 = vsel %vm1460_vm6, %v4843_v3, 0.0 }
 0x442   :  { %v1511_v59 = vsel %vm1463_vm10, %v3548_v38, 0.0  ;;  %v1556_v44 = vsel %vm1412_vm14, %v4845_v25, %v1508_v41  ;;  %vm1464_vm11 = vcmp.eq.s32.totalorder %v4813_v21, %v802_v62  ;;  %vm1465_vm12 = vcmp.eq.s32.totalorder %v3519_v48, %v802_v62  ;;  %v4853_v41 = vld [vmem:[#allocation33_spill] sm:$0xff] }
 0x443   :  { %v4058_v17 = vsel %vm1415_vm8, %v4844_v28, %v1511_v59  ;;  %v4846_v38 = vmax.f32 %v3790_v11, 0.0  ;;  %vm1466_vm2 = vcmp.eq.s32.totalorder %v3517_v2, %v802_v62  ;;  %v4070_v10 = vsel %vm1464_vm11, %v3551_v42, 0.0  ;;  %v4848_v11 = vld [vmem:[#allocation31_spill] sm:$0xff]  ;;  %v858_v62 = vpop.xlane.xlu1 %857 }
 0x444   :  { %v4073_v31 = vsel %vm1465_vm12, %v3551_v42, 0.0  ;;  %vm1427_vm8 = vcmp.eq.s32.totalorder %v3517_v2, %v4847_v39  ;;  %v1514_v0 = vsel %vm1466_vm2, %v3551_v42, 0.0  ;;  %vm1467_vm14 = vcmp.eq.s32.totalorder %v4813_v21, %v817_v57 }
 0x445   :  { %v1604_v55 = vmul.f32 %v1556_v44, %v4846_v38  ;;  %vm1468_vm3 = vcmp.eq.s32.totalorder %v3519_v48, %v817_v57  ;;  %vm1469_vm6 = vcmp.eq.s32.totalorder %v3517_v2, %v817_v57  ;;  %vm1424_vm5 = vcmp.eq.s32.totalorder %v3517_v2, %v4848_v11  ;;  %v4854_v44 = vld [vmem:[#allocation18_spill] sm:$0xff] }
 0x446   :  { %v4087_v7 = vsel %vm1418_vm9, %v4849_v24, %v1514_v0  ;;  %v4090_v29 = vsel %vm1467_vm14, %v4850_v14, 0.0  ;;  %v4093_v42 = vsel %vm1468_vm3, %v4850_v14, 0.0  ;;  %v1517_v58 = vsel %vm1469_vm6, %v4850_v14, 0.0  ;;  %v4856_v14 = vld [vmem:[#allocation4_spill] sm:$0xff] }
 0x447   :  { %v1643_v23 = vpack.c.bf16 %v1604_v55, %v1601_v6  ;;  %4851 = vst [vmem:[#allocation23_spill] sm:$0xff] %v4090_v29  ;;  %v829_v57 = vcvt.f32.s32 %v828_v46  ;;  %v4852_v3 = vmax.f32 %v3605_v37, 0.0  ;;  %v844_v6 = vcvt.f32.s32 %v843_v54 }
 0x448   :  { %vm1408_vm7 = vcmp.eq.s32.totalorder %v3519_v48, %v4827_v27  ;;  %vm1430_vm9 = vcmp.eq.s32.totalorder %v3517_v2, %v4853_v41  ;;  %v1565_v38 = vsel %vm1421_vm13, %v4854_v44, %v1517_v58  ;;  %v859_v55 = vcvt.f32.s32 %v858_v62 }
 0x449   :  { %v1597_v59 = vmul.f32 %v1549_v45, %v4852_v3  ;;  %2258 = vmatprep.mubr.msk.bf16.mxu1 %vm250_vm1, %v1643_v23  ;;  %v1545_v37 = vsel %vm1401_vm15, %v4830_v30, %v3943_v60  ;;  %v1548_v45 = vsel %vm1404_vm4, %v4834_v36, %v3975_v15  ;;  %vm1411_vm10 = vcmp.eq.s32.totalorder %v3519_v48, %v4835_v63  ;;  %v873_v60 = vpop.xlane.xlu0 %872  ;;  %v4857_v30 = vld [vmem:[#allocation11_spill] sm:$0xff]  ;;  %v4858_v3 = vld [vmem:[#allocation50_spill] sm:$0xff]  ;;  %v4860_v36 = vld [vmem:[#allocation52_spill] sm:$0xff] }
 0x44a   :  { %v4855_v46 = vmax.f32 %v3809_v20, 0.0  ;;  %v832_v0 = vadd.s32 %v3724_v13, %v829_v57  ;;  %v847_v12 = vadd.s32 %v4856_v14, %v844_v6  ;;  %v862_v62 = vadd.s32 %v4857_v30, %v859_v55  ;;  %v4862_v13 = vld [vmem:[#allocation34_spill] sm:$0xff]  ;;  %v4863_v20 = vld [vmem:[#allocation45_spill] sm:$0xff] }
 0x44b   :  { %v1639_v23 = vpack.c.bf16 %v1597_v59, %v4027_v26  ;;  %v874_v58 = vcvt.f32.s32 %v873_v60  ;;  %v4859_v9 = vmax.f32 %v4858_v3, 0.0  ;;  %v4861_v29 = vmax.f32 %v4860_v36, 0.0  ;;  %v4864_v59 = vld [vmem:[#allocation47_spill] sm:$0xff]  ;;  %v4869_v60 = vld [vmem:[#allocation48_spill] sm:$0xff] }
 0x44c   :  { %v4121_v54 = vmul.f32 %v1565_v38, %v4855_v46  ;;  %vm1470_vm13 = vcmp.eq.s32.totalorder %v4813_v21, %v832_v0  ;;  %vm1471_vm15 = vcmp.eq.s32.totalorder %v3519_v48, %v832_v0  ;;  %vm1472_vm4 = vcmp.eq.s32.totalorder %v3517_v2, %v832_v0  ;;  %v4867_v0 = vld [vmem:[#allocation20_spill] sm:$0xff]  ;;  %v4871_v36 = vld [vmem:[#allocation3_spill] sm:$0xff] }
 0x44d   :  { %v1593_v15 = vmul.f32 %v1545_v37, %v4859_v9  ;;  %v1596_v5 = vmul.f32 %v1548_v45, %v4861_v29  ;;  %1859 = vmatprep.mubr.bf16.mxu0 %v1639_v23  ;;  %vm1473_vm11 = vcmp.eq.s32.totalorder %v4813_v21, %v847_v12  ;;  %vm1433_vm12 = vcmp.eq.s32.totalorder %v3517_v2, %v4862_v13  ;;  %v888_v29 = vpop.xlane.xlu1 %887  ;;  %v4866_v45 = vld [vmem:[#allocation21_spill] sm:$0xff] }
 0x44e   :  { %v4138_v26 = vsel %vm1470_vm13, %v4863_v20, 0.0  ;;  %v4141_v57 = vsel %vm1471_vm15, %v4863_v20, 0.0  ;;  %vm1474_vm2 = vcmp.eq.s32.totalorder %v3519_v48, %v847_v12  ;;  %vm1475_vm14 = vcmp.eq.s32.totalorder %v3517_v2, %v847_v12 }
 0x44f   :  { %v4146_v6 = vsel %vm1473_vm11, %v4864_v59, 0.0  ;;  %v4149_v38 = vsel %vm1474_vm2, %v4864_v59, 0.0  ;;  %v1523_v55 = vsel %vm1475_vm14, %v4864_v59, 0.0  ;;  %v1520_v37 = vsel %vm1472_vm4, %v4863_v20, 0.0 }
 0x450   :  { %4865 = vst [vmem:[#allocation24_spill] sm:$0xff] %v4146_v6  ;;  %vm1407_vm3 = vcmp.eq.s32.totalorder %v4813_v21, %v4827_v27  ;;  %vm1410_vm6 = vcmp.eq.s32.totalorder %v4813_v21, %v4835_v63  ;;  %vm1414_vm13 = vcmp.eq.s32.totalorder %v3519_v48, %v4833_v49  ;;  %v4163_v46 = vsel %vm1427_vm8, %v4866_v45, %v1523_v55  ;;  %v4872_v55 = vld [vmem:[#allocation35_spill] sm:$0xff]  ;;  %v4887_v27 = vld [vmem:[#allocation17_spill] sm:$0xff] }
 0x451   :  { %v1568_v23 = vsel %vm1424_vm5, %v4867_v0, %v1520_v37  ;;  %vm1476_vm15 = vcmp.eq.s32.totalorder %v4813_v21, %v862_v62  ;;  %vm1477_vm4 = vcmp.eq.s32.totalorder %v3519_v48, %v862_v62  ;;  %v4868_v14 = vmax.f32 %v3830_v52, 0.0  ;;  %v4873_v37 = vld [vmem:[#allocation39_spill] sm:$0xff] }
 0x452   :  { %vm1478_vm11 = vcmp.eq.s32.totalorder %v3517_v2, %v862_v62  ;;  %v4175_v30 = vsel %vm1476_vm15, %v4869_v60, 0.0  ;;  %v4178_v3 = vsel %vm1477_vm4, %v4869_v60, 0.0  ;;  %v877_v20 = vadd.s32 %v4871_v36, %v874_v58  ;;  %v4874_v58 = vld [vmem:[#allocation56_spill] sm:$0xff]  ;;  %v4879_v36 = vld [vmem:[#allocation51_spill] sm:$0xff] }
 0x453   :  { %v1616_v12 = vmul.f32 %v1568_v23, %v4868_v14  ;;  %4870 = vst [vmem:[#allocation6_spill] sm:$0xff] %v4175_v30  ;;  %v1526_v9 = vsel %vm1478_vm11, %v4869_v60, 0.0  ;;  %v1638_v59 = vpack.c.bf16 %v1596_v5, %v1593_v15  ;;  %v1552_v52 = vsel %vm1408_vm7, %v4837_v43, %v3996_v32  ;;  %v4876_v14 = vld [vmem:[#allocation36_spill] sm:$0xff] }
 0x454   :  { %vm1436_vm8 = vcmp.eq.s32.totalorder %v3517_v2, %v4872_v55  ;;  %v4194_v23 = vsel %vm1430_vm9, %v4873_v37, %v1526_v9  ;;  %v1555_v5 = vsel %vm1411_vm10, %v4845_v25, %v4042_v22  ;;  %v4875_v15 = vmax.f32 %v4874_v58, 0.0  ;;  %v903_v9 = vpop.xlane.xlu0 %902  ;;  %v918_v22 = vpop.xlane.xlu1 %917 }
 0x455   :  { %v1649_v62 = vpack.c.bf16 %v1616_v12, %v4121_v54  ;;  %vm1439_vm5 = vcmp.eq.s32.totalorder %v3517_v2, %v4876_v14  ;;  %vm1479_vm7 = vcmp.eq.s32.totalorder %v4813_v21, %v877_v20  ;;  %vm1480_vm2 = vcmp.eq.s32.totalorder %v3519_v48, %v877_v20  ;;  %1860 = vmatmul.mubr.bf16.gmra.mxu0 %v1638_v59  ;;  %v4877_v54 = vld [vmem:[#allocation59_spill] sm:$0xff] }
 0x456   :  { %v1600_v32 = vmul.f32 %v1552_v52, %v4875_v15  ;;  %vm1481_vm14 = vcmp.eq.s32.totalorder %v3517_v2, %v877_v20  ;;  %v4878_v12 = vmax.f32 %v4877_v54, 0.0  ;;  %vm1437_vm9 = vcmp.eq.s32.totalorder %v4813_v21, %v4876_v14  ;;  %v4882_v54 = vld [vmem:[#allocation41_spill] sm:$0xff] }
 0x457   :  { %vm1438_vm10 = vcmp.eq.s32.totalorder %v3519_v48, %v4876_v14  ;;  %v4215_v52 = vsel %vm1479_vm7, %v4879_v36, 0.0  ;;  %v4218_v58 = vsel %vm1480_vm2, %v4879_v36, 0.0  ;;  %v1529_v20 = vsel %vm1481_vm14, %v4879_v36, 0.0  ;;  %v4886_v36 = vld [vmem:[#allocation37_spill] sm:$0xff] }
 0x458   :  { %v1603_v60 = vmul.f32 %v1555_v5, %v4878_v12  ;;  %4880 = vst [vmem:[#allocation25_spill] sm:$0xff] %v4215_v52  ;;  %4881 = vst [vmem:[#allocation40_spill] sm:$0xff] %v4218_v58  ;;  %v889_v59 = vcvt.f32.s32 %v888_v29  ;;  %v1577_v5 = vsel %vm1433_vm12, %v4882_v54, %v1529_v20  ;;  %v4883_v12 = vmax.f32 %v3745_v56, 0.0  ;;  %v4896_v14 = vld [vmem:[#allocation57_spill] sm:$0xff] }
 0x459   :  { %v4884_v6 = vmax.f32 %v3769_v61, 0.0  ;;  %v4885_v37 = vmax.f32 %v3845_v51, 0.0  ;;  %vm1440_vm15 = vcmp.eq.s32.totalorder %v4813_v21, %v4886_v36  ;;  %vm1417_vm12 = vcmp.eq.s32.totalorder %v3519_v48, %v4839_v53 }
 0x45a   :  { %v1642_v15 = vpack.c.bf16 %v1603_v60, %v1600_v32  ;;  %v1607_v30 = vmul.f32 %v4058_v17, %v4883_v12  ;;  %v892_v29 = vadd.s32 %v3779_v16, %v889_v59  ;;  %v904_v32 = vcvt.f32.s32 %v903_v9  ;;  %v4889_v17 = vld [vmem:[#allocation13_spill] sm:$0xff]  ;;  %v4893_v59 = vld [vmem:[#allocation46_spill] sm:$0xff] }
 0x45b   :  { %v1610_v52 = vmul.f32 %v4087_v7, %v4884_v6  ;;  %v4233_v58 = vmul.f32 %v1577_v5, %v4885_v37  ;;  %v919_v60 = vcvt.f32.s32 %v918_v22  ;;  %vm1442_vm4 = vcmp.eq.s32.totalorder %v3517_v2, %v4886_v36  ;;  %v4890_v7 = vld [vmem:[#allocation43_spill] sm:$0xff] }
 0x45c   :  { %1867 = vmatprep.mubr.bf16.mxu0 %v1642_v15  ;;  %v1551_v56 = vsel %vm1407_vm3, %v4837_v43, %v3993_v8  ;;  %v1554_v16 = vsel %vm1410_vm6, %v4845_v25, %v4039_v4  ;;  %v1558_v51 = vsel %vm1414_vm13, %v4844_v28, %v4050_v33  ;;  %vm1482_vm11 = vcmp.eq.s32.totalorder %v4813_v21, %v892_v29  ;;  %v4888_v43 = vld [vmem:[#allocation54_spill] sm:$0xff] }
 0x45d   :  { %v1646_v61 = vpack.c.bf16 %v1610_v52, %v1607_v30  ;;  %vm1483_vm7 = vcmp.eq.s32.totalorder %v3519_v48, %v892_v29  ;;  %vm1484_vm2 = vcmp.eq.s32.totalorder %v3517_v2, %v892_v29  ;;  %v907_v8 = vadd.s32 %v4887_v27, %v904_v32  ;;  %v4891_v30 = vld [vmem:[#allocation55_spill] sm:$0xff]  ;;  %v4897_v27 = vld [vmem:[#allocation53_spill] sm:$0xff] }
 0x45e   :  { %vm1413_vm3 = vcmp.eq.s32.totalorder %v4813_v21, %v4833_v49  ;;  %v4264_v63 = vsel %vm1482_vm11, %v4888_v43, 0.0  ;;  %v4267_v4 = vsel %vm1483_vm7, %v4888_v43, 0.0  ;;  %v1532_v33 = vsel %vm1484_vm2, %v4888_v43, 0.0  ;;  %v4899_v43 = vld [vmem:[#allocation58_spill] sm:$0xff] }
 0x45f   :  { %2259 = vmatmul.mubr.msk.bf16.gmra.mxu1 %vm250_vm1, %v1646_v61  ;;  %v922_v25 = vadd.s32 %v4889_v17, %v919_v60  ;;  %vm1441_vm6 = vcmp.eq.s32.totalorder %v3519_v48, %v4886_v36  ;;  %vm1416_vm13 = vcmp.eq.s32.totalorder %v4813_v21, %v4839_v53  ;;  %vm1485_vm14 = vcmp.eq.s32.totalorder %v4813_v21, %v907_v8 }
 0x460   :  { %vm1486_vm11 = vcmp.eq.s32.totalorder %v3519_v48, %v907_v8  ;;  %vm1487_vm0 = vcmp.eq.s32.totalorder %v3517_v2, %v907_v8  ;;  %v1580_v6 = vsel %vm1436_vm8, %v4890_v7, %v1532_v33  ;;  %2262 = vmatprep.mubr.msk.bf16.mxu1 %vm250_vm1, %v1649_v62  ;;  %vm1420_vm7 = vcmp.eq.s32.totalorder %v3519_v48, %v4841_v50 }
 0x461   :  { %v1535_v37 = vsel %vm1487_vm0, %v4891_v30, 0.0  ;;  %v1533_v9 = vsel %vm1485_vm14, %v4891_v30, 0.0  ;;  %v1534_v22 = vsel %vm1486_vm11, %v4891_v30, 0.0  ;;  %v4892_v52 = vmax.f32 %v3873_v1, 0.0 }
 0x462   :  { %vm1423_vm2 = vcmp.eq.s32.totalorder %v3519_v48, %v4848_v11  ;;  %v1583_v62 = vsel %vm1439_vm5, %v4893_v59, %v1535_v37  ;;  %v1581_v15 = vsel %vm1437_vm9, %v4893_v59, %v1533_v9  ;;  %v1582_v5 = vsel %vm1438_vm10, %v4893_v59, %v1534_v22  ;;  %v4905_v59 = vld [vmem:[#allocation63_spill] sm:$0xff] }
 0x463   :  { %v1628_v20 = vmul.f32 %v1580_v6, %v4892_v52  ;;  %vm1488_vm0 = vcmp.eq.s32.totalorder %v4813_v21, %v922_v25  ;;  %vm1419_vm8 = vcmp.eq.s32.totalorder %v4813_v21, %v4841_v50  ;;  %v4894_v1 = vmax.f32 %v3850_v40, 0.0 }
 0x464   :  { %v4895_v29 = vmax.f32 %v3868_v35, 0.0  ;;  %vm1489_vm5 = vcmp.eq.s32.totalorder %v3519_v48, %v922_v25  ;;  %vm1426_vm9 = vcmp.eq.s32.totalorder %v3519_v48, %v4847_v39  ;;  %vm1490_vm10 = vcmp.eq.s32.totalorder %v3517_v2, %v922_v25 }
 0x465   :  { %v4312_v12 = vmul.f32 %v1581_v15, %v4894_v1  ;;  %v1655_v60 = vpack.c.bf16 %v1628_v20, %v4233_v58  ;;  %v1536_v61 = vsel %vm1488_vm0, %v4896_v14, 0.0  ;;  %v4898_v8 = vmax.f32 %v4897_v27, 0.0  ;;  %v4901_v58 = vld [vmem:[#allocation49_spill] sm:$0xff] }
 0x466   :  { %v4316_v32 = vmul.f32 %v1582_v5, %v4895_v29  ;;  %v4900_v33 = vmax.f32 %v4899_v43, 0.0  ;;  %vm1429_vm11 = vcmp.eq.s32.totalorder %v3519_v48, %v4853_v41  ;;  %vm1425_vm14 = vcmp.eq.s32.totalorder %v4813_v21, %v4847_v39 }
 0x467   :  { %v1599_v40 = vmul.f32 %v1551_v56, %v4898_v8  ;;  %v1538_v35 = vsel %vm1490_vm10, %v4896_v14, 0.0  ;;  %v1584_v6 = vsel %vm1440_vm15, %v4901_v58, %v1536_v61  ;;  %v1561_v56 = vsel %vm1417_vm12, %v4849_v24, %v4073_v31  ;;  %v4913_v8 = vld [vmem:[#allocation62_spill] sm:$0xff] }
 0x468   :  { %v1602_v17 = vmul.f32 %v1554_v16, %v4900_v33  ;;  %v4902_v16 = vld [vmem:[#allocation61_spill] sm:$0xff]  ;;  %vm1428_vm0 = vcmp.eq.s32.totalorder %v4813_v21, %v4853_v41  ;;  %v1586_v9 = vsel %vm1442_vm4, %v4901_v58, %v1538_v35  ;;  %v4904_v22 = vmax.f32 %v3876_v19, 0.0  ;;  %v4907_v19 = vld [vmem:[#allocation67_spill] sm:$0xff]  ;;  %v4917_v33 = vld [vmem:[#allocation70_spill] sm:$0xff] }
 0x469   :  { %v4903_v30 = vmax.f32 %v4902_v16, 0.0  ;;  %v4906_v15 = vmax.f32 %v4905_v59, 0.0  ;;  %vm1432_vm15 = vcmp.eq.s32.totalorder %v3519_v48, %v4862_v13  ;;  %vm1435_vm12 = vcmp.eq.s32.totalorder %v3519_v48, %v4872_v55  ;;  %v4941_v41 = vld [vmem:[#allocation25_spill] sm:$0xff] }
 0x46a   :  { %v4352_v52 = vmul.f32 %v1584_v6, %v4904_v22  ;;  %v1641_v20 = vpack.c.bf16 %v1602_v17, %v1599_v40  ;;  %vm1431_vm10 = vcmp.eq.s32.totalorder %v4813_v21, %v4862_v13  ;;  %v1537_v2 = vsel %vm1489_vm5, %v4896_v14, 0.0  ;;  %v4923_v22 = vld [vmem:[#allocation23_spill] sm:$0xff] }
 0x46b   :  { %v1606_v37 = vmul.f32 %v1558_v51, %v4903_v30  ;;  %v1609_v5 = vmul.f32 %v1561_v56, %v4906_v15  ;;  %v4908_v31 = vmax.f32 %v4907_v19, 0.0  ;;  %v4909_v1 = vmax.f32 %v3817_v47, 0.0 }
 0x46c   :  { %v1557_v61 = vsel %vm1413_vm3, %v4844_v28, %v4047_v18  ;;  %vm1434_vm4 = vcmp.eq.s32.totalorder %v4813_v21, %v4872_v55  ;;  %1868 = vmatmul.mubr.bf16.gmra.mxu0 %v1641_v20  ;;  %v1560_v47 = vsel %vm1416_vm13, %v4849_v24, %v4070_v10  ;;  %v4912_v18 = vmax.f32 %v3886_v34, 0.0  ;;  %v4915_v10 = vld [vmem:[#allocation65_spill] sm:$0xff]  ;;  %v4925_v20 = vld [vmem:[#allocation64_spill] sm:$0xff] }
 0x46d   :  { %v1619_v51 = vmul.f32 %v4163_v46, %v4908_v31  ;;  %v1622_v29 = vmul.f32 %v4194_v23, %v4909_v1  ;;  %v1645_v25 = vpack.c.bf16 %v1609_v5, %v1606_v37  ;;  %v1585_v46 = vsel %vm1441_vm6, %v4901_v58, %v1537_v2  ;;  %v4910_v23 = vld [vmem:[#allocation60_spill] sm:$0xff]  ;;  %v4927_v5 = vld [vmem:[#allocation66_spill] sm:$0xff]  ;;  %v4929_v31 = vld [vmem:[#allocation39_spill] sm:$0xff] }
 0x46e   :  { %v4911_v14 = vmax.f32 %v4910_v23, 0.0  ;;  %v1633_v28 = vmul.f32 %v1585_v46, %v4912_v18  ;;  %v4914_v40 = vmax.f32 %v4913_v8, 0.0  ;;  %v1564_v36 = vsel %vm1420_vm7, %v4854_v44, %v4093_v42  ;;  %v4919_v58 = vld [vmem:[#allocation72_spill] sm:$0xff]  ;;  %v4921_v42 = vld [vmem:[#allocation5_spill] sm:$0xff]  ;;  %v4935_v46 = vld [vmem:[#allocation6_spill] sm:$0xff] }
 0x46f   :  { %v1652_v27 = vpack.c.bf16 %v1622_v29, %v1619_v51  ;;  %1875 = vmatprep.mubr.bf16.mxu0 %v1645_v25  ;;  %v1567_v53 = vsel %vm1423_vm2, %v4867_v0, %v4141_v57  ;;  %v4916_v34 = vmax.f32 %v4915_v10, 0.0  ;;  %v4918_v17 = vmax.f32 %v4917_v33, 0.0  ;;  %v4932_v51 = vld [vmem:[#allocation24_spill] sm:$0xff] }
 0x470   :  { %v1605_v49 = vmul.f32 %v1557_v61, %v4911_v14  ;;  %v1608_v43 = vmul.f32 %v1560_v47, %v4914_v40  ;;  %v4920_v6 = vmax.f32 %v4919_v58, 0.0  ;;  %v4922_v30 = vmax.f32 %v4921_v42, 0.0  ;;  %v4933_v61 = vld [vmem:[#allocation68_spill] sm:$0xff] }
 0x471   :  { %v1612_v24 = vmul.f32 %v1564_v36, %v4916_v34  ;;  %v1631_v35 = vmul.f32 %v1583_v62, %v4918_v17  ;;  %2263 = vmatmul.mubr.msk.bf16.gmra.mxu1 %vm250_vm1, %v1652_v27  ;;  %v1563_v57 = vsel %vm1419_vm8, %v4854_v44, %v4923_v22  ;;  %vm4924_vm3 = vcmp.eq.s32.totalorder %v4813_v21, %v4848_v11  ;;  %v4940_v8 = vld [vmem:[#allocation40_spill] sm:$0xff]  ;;  %v4942_v36 = vld [vmem:[#allocation22_spill] sm:$0xff]  ;;  %v4944_v34 = vld [vmem:[#allocation71_spill] sm:$0xff] }
 0x472   :  { %v1634_v56 = vmul.f32 %v1586_v9, %v4920_v6  ;;  %v1644_v16 = vpack.c.bf16 %v1608_v43, %v1605_v49  ;;  %v1615_v37 = vmul.f32 %v1567_v53, %v4922_v30  ;;  %v1566_v62 = vsel %vm4924_vm3, %v4867_v0, %v4138_v26  ;;  %2266 = vmatprep.mubr.msk.bf16.mxu1 %vm250_vm1, %v1655_v60  ;;  %v4930_v26 = vld [vmem:[#allocation8_spill] sm:$0xff]  ;;  %v4938_v49 = vld [vmem:[#allocation19_spill] sm:$0xff]  ;;  %v4946_v17 = vld [vmem:[#allocation69_spill] sm:$0xff] }
 0x473   :  { %v4926_v59 = vmax.f32 %v4925_v20, 0.0  ;;  %v4928_v2 = vmax.f32 %v4927_v5, 0.0  ;;  %v1570_v50 = vsel %vm1426_vm9, %v4866_v45, %v4149_v38  ;;  %v1573_v11 = vsel %vm1429_vm11, %v4929_v31, %v4178_v3  ;;  %v4936_v3 = vld [vmem:[#allocation2_spill] sm:$0xff] }
 0x474   :  { %v1658_v9 = vpack.c.bf16 %v1634_v56, %v1631_v35  ;;  %v1648_v44 = vpack.c.bf16 %v1615_v37, %v1612_v24  ;;  %v4931_v0 = vmax.f32 %v4930_v26, 0.0  ;;  %v1569_v1 = vsel %vm1425_vm14, %v4866_v45, %v4932_v51  ;;  %1876 = vmatmul.mubr.bf16.gmra.mxu0 %v1644_v16 }
 0x475   :  { %v1611_v15 = vmul.f32 %v1563_v57, %v4926_v59  ;;  %v1614_v19 = vmul.f32 %v1566_v62, %v4928_v2  ;;  %v4934_v25 = vmax.f32 %v4933_v61, 0.0  ;;  %v1572_v47 = vsel %vm1428_vm0, %v4929_v31, %v4935_v46 }
 0x476   :  { %v1618_v60 = vmul.f32 %v1570_v50, %v4931_v0  ;;  %v4937_v23 = vmax.f32 %v4936_v3, 0.0  ;;  %v4939_v18 = vmax.f32 %v4938_v49, 0.0  ;;  %v1576_v39 = vsel %vm1432_vm15, %v4882_v54, %v4940_v8  ;;  %1883 = vmatprep.mubr.bf16.mxu0 %v1648_v44 }
 0x477   :  { %v1647_v29 = vpack.c.bf16 %v1614_v19, %v1611_v15  ;;  %v1621_v38 = vmul.f32 %v1573_v11, %v4934_v25  ;;  %v1579_v45 = vsel %vm1435_vm12, %v4890_v7, %v4267_v4  ;;  %v1575_v40 = vsel %vm1431_vm10, %v4882_v54, %v4941_v41  ;;  %v4948_v54 = vld [vmem:[#allocation38_spill] sm:$0xff] }
 0x478   :  { %v1617_v14 = vmul.f32 %v1569_v1, %v4937_v23  ;;  %v1620_v27 = vmul.f32 %v1572_v47, %v4939_v18  ;;  %v4943_v53 = vmax.f32 %v4942_v36, 0.0  ;;  %v4945_v24 = vmax.f32 %v4944_v34, 0.0 }
 0x479   :  { %v1651_v43 = vpack.c.bf16 %v1621_v38, %v1618_v60  ;;  %v1578_v48 = vsel %vm1434_vm4, %v4890_v7, %v4264_v63  ;;  %v4947_v35 = vmax.f32 %v4946_v17, 0.0  ;;  %v4949_v58 = vmax.f32 %v4948_v54, 0.0  ;;  %2267 = vmatmul.mubr.msk.bf16.gmra.mxu1 %vm250_vm1, %v1658_v9 }
 0x47a   :  { %v1624_v10 = vmul.f32 %v1576_v39, %v4943_v53  ;;  %v1627_v33 = vmul.f32 %v1579_v45, %v4945_v24  ;;  %v1650_v4 = vpack.c.bf16 %v1620_v27, %v1617_v14  ;;  %v1657_v56 = vpack.c.bf16 %v1633_v28, %v4316_v32 }
 0x47b   :  { %v1623_v13 = vmul.f32 %v1575_v40, %v4947_v35  ;;  %v1626_v6 = vmul.f32 %v1578_v48, %v4949_v58  ;;  %v1656_v42 = vpack.c.bf16 %v4352_v52, %v4312_v12  ;;  %vm4950_vm6 = vcmask 261120  }
 0x47c   :  { %v1654_v16 = vpack.c.bf16 %v1627_v33, %v1624_v10  ;;  %1884 = vmatmul.mubr.bf16.gmra.mxu0 %v1647_v29  ;;  %vm4951_vm1 = vmmov %vm4950_vm6 }
 0x47d   :  { %v1653_v30 = vpack.c.bf16 %v1626_v6, %v1623_v13  ;;  %1891 = vmatprep.mubr.bf16.mxu0 %v1651_v43  ;;  %vm4952_vm13 = vmmov %vm4951_vm1 }
 0x47e   :  { %vm4953_vm7 = vmmov %vm4951_vm1 }
 0x47f   :  { %vm4954_vm2 = vmmov %vm4951_vm1 }
 0x480   :  { %vm4955_vm8 = vmmov %vm4951_vm1 }
 0x481   :  { %vm4956_vm14 = vmmov %vm4951_vm1 }
 0x482   :  { %vm4957_vm5 = vmmov %vm4951_vm1 }
 0x483   :  { %vm4958_vm9 = vmmov %vm4951_vm1 }
 0x484   :  { %1892 = vmatmul.mubr.bf16.gmra.mxu0 %v1650_v4  ;;  %vm4959_vm11 = vmmov %vm4951_vm1 }
 0x485   :  { %1899 = vmatprep.mubr.bf16.mxu0 %v1654_v16  ;;  %vm4960_vm0 = vmmov %vm4951_vm1 }
 0x486   :  { %vm4961_vm15 = vmmov %vm4960_vm0 }
 0x487   :  { %vm4962_vm12 = vmmov %vm4960_vm0 }
 0x488   :  { %vm4963_vm10 = vmmov %vm4960_vm0 }
 0x489   :  { %vm4964_vm4 = vmmov %vm4960_vm0 }
 0x48a   :  { %vm4965_vm3 = vmmov %vm4960_vm0 }
 0x48c   :  { %1900 = vmatmul.mubr.bf16.gmra.mxu0 %v1653_v30 }
 0x48d   :  { %1907 = vmatprep.mubr.bf16.mxu0 %v1657_v56 }
 0x494   :  { %1908 = vmatmul.mubr.bf16.gmra.mxu0 %v1656_v42 }
 0x4fe   :  { %v2256_v21 = vpop.f32.mrf.mxu1 }
 0x500   :  { %v2143_v55 = vpop.f32.mrf.mxu0  ;;  %v1950_v63 = vpop.f32.mrf.mxu1 }
 0x502   :  { %v2144_v7 = vpop.f32.mrf.mxu0  ;;  %v2257_v37 = vpop.f32.mrf.mxu1 }
 0x503   :  { %v2145_v32 = vadd.f32 %v2144_v7, %v2143_v55 }
 0x504   :  { %v2146_v28 = vpop.f32.mrf.mxu0  ;;  %v1953_v12 = vpop.f32.mrf.mxu1 }
 0x505   :  { %v1951_v22 = vadd.f32 %v2145_v32, %v1950_v63 }
 0x506   :  { %v2147_v57 = vpop.f32.mrf.mxu0 }
 0x507   :  { %2013 = vst.msk [vmem:[%s4558_s7] sm:$0xff] %vm4950_vm6, %v1951_v22  ;;  %v2148_v52 = vadd.f32 %v2147_v57, %v2146_v28 }
 0x509   :  { %v1954_v62 = vadd.f32 %v2148_v52, %v1953_v12 }
 0x50b   :  { %2014 = vst.msk [vmem:[%s4558_s7 + $0x8] sm:$0xff] %vm4951_vm1, %v1954_v62 }
 0x515   :  { %v2149_v9 = vpop.f32.mrf.mxu0 }
 0x517   :  { %v2150_v20 = vpop.f32.mrf.mxu0 }
 0x518   :  { %v2151_v59 = vadd.f32 %v2150_v20, %v2149_v9 }
 0x519   :  { %v2152_v15 = vpop.f32.mrf.mxu0 }
 0x51a   :  { %v1959_v5 = vadd.f32 %v2256_v21, %v2151_v59 }
 0x51b   :  { %v2153_v2 = vpop.f32.mrf.mxu0 }
 0x51c   :  { %2015 = vst.msk [vmem:[%s4558_s7 + $0x10] sm:$0xff] %vm4952_vm13, %v1959_v5  ;;  %v2154_v19 = vadd.f32 %v2153_v2, %v2152_v15 }
 0x51e   :  { %v1962_v50 = vadd.f32 %v2257_v37, %v2154_v19 }
 0x51f   :  { %v2260_v44 = vpop.f32.mrf.mxu1 }
 0x520   :  { %2016 = vst.msk [vmem:[%s4558_s7 + $0x18] sm:$0xff] %vm4953_vm7, %v1962_v50 }
 0x521   :  { %v1966_v31 = vpop.f32.mrf.mxu1 }
 0x523   :  { %v2261_v60 = vpop.f32.mrf.mxu1 }
 0x525   :  { %v1969_v25 = vpop.f32.mrf.mxu1 }
 0x52c   :  { %v2155_v11 = vpop.f32.mrf.mxu0 }
 0x52e   :  { %v2156_v26 = vpop.f32.mrf.mxu0 }
 0x52f   :  { %v2157_v0 = vadd.f32 %v2156_v26, %v2155_v11 }
 0x530   :  { %v2158_v51 = vpop.f32.mrf.mxu0 }
 0x531   :  { %v1967_v1 = vadd.f32 %v2157_v0, %v1966_v31  ;;  %v2264_v23 = vpop.f32.mrf.mxu1 }
 0x532   :  { %v2159_v29 = vpop.f32.mrf.mxu0 }
 0x533   :  { %2017 = vst.msk [vmem:[%s4558_s7 + $0x20] sm:$0xff] %vm4954_vm2, %v1967_v1  ;;  %v2160_v61 = vadd.f32 %v2159_v29, %v2158_v51  ;;  %v1982_v8 = vpop.f32.mrf.mxu1 }
 0x534   :  { %v2161_v38 = vpop.f32.mrf.mxu0 }
 0x535   :  { %v1970_v46 = vadd.f32 %v2160_v61, %v1969_v25  ;;  %v2265_v43 = vpop.f32.mrf.mxu1 }
 0x536   :  { %v2162_v47 = vpop.f32.mrf.mxu0 }
 0x537   :  { %2018 = vst.msk [vmem:[%s4558_s7 + $0x28] sm:$0xff] %vm4955_vm8, %v1970_v46  ;;  %v2163_v3 = vadd.f32 %v2162_v47, %v2161_v38  ;;  %v1985_v24 = vpop.f32.mrf.mxu1 }
 0x538   :  { %v2164_v14 = vpop.f32.mrf.mxu0 }
 0x539   :  { %v1975_v49 = vadd.f32 %v2260_v44, %v2163_v3  ;;  %v2268_v35 = vpop.f32.mrf.mxu1 }
 0x53a   :  { %v2165_v18 = vpop.f32.mrf.mxu0 }
 0x53b   :  { %2019 = vst.msk [vmem:[%s4558_s7 + $0x30] sm:$0xff] %vm4956_vm14, %v1975_v49  ;;  %v2166_v27 = vadd.f32 %v2165_v18, %v2164_v14  ;;  %v1998_v56 = vpop.f32.mrf.mxu1 }
 0x53c   :  { %v2167_v39 = vpop.f32.mrf.mxu0 }
 0x53d   :  { %v1978_v45 = vadd.f32 %v2261_v60, %v2166_v27  ;;  %v2269_v55 = vpop.f32.mrf.mxu1 }
 0x53e   :  { %v2168_v41 = vpop.f32.mrf.mxu0 }
 0x53f   :  { %2020 = vst.msk [vmem:[%s4558_s7 + $0x38] sm:$0xff] %vm4957_vm5, %v1978_v45  ;;  %v2169_v40 = vadd.f32 %v2168_v41, %v2167_v39  ;;  %v2001_v28 = vpop.f32.mrf.mxu1 }
 0x540   :  { %v2170_v36 = vpop.f32.mrf.mxu0 }
 0x541   :  { %v1983_v53 = vadd.f32 %v2169_v40, %v1982_v8 }
 0x542   :  { %v2171_v10 = vpop.f32.mrf.mxu0 }
 0x543   :  { %2021 = vst.msk [vmem:[%s4558_s7 + $0x40] sm:$0xff] %vm4958_vm9, %v1983_v53  ;;  %v2172_v34 = vadd.f32 %v2171_v10, %v2170_v36 }
 0x544   :  { %v2173_v33 = vpop.f32.mrf.mxu0 }
 0x545   :  { %v1986_v48 = vadd.f32 %v2172_v34, %v1985_v24 }
 0x546   :  { %v2174_v4 = vpop.f32.mrf.mxu0 }
 0x547   :  { %2022 = vst.msk [vmem:[%s4558_s7 + $0x48] sm:$0xff] %vm4959_vm11, %v1986_v48  ;;  %v2175_v17 = vadd.f32 %v2174_v4, %v2173_v33 }
 0x548   :  { %v2176_v13 = vpop.f32.mrf.mxu0 }
 0x549   :  { %v1991_v54 = vadd.f32 %v2264_v23, %v2175_v17 }
 0x54a   :  { %v2177_v58 = vpop.f32.mrf.mxu0 }
 0x54b   :  { %2023 = vst.msk [vmem:[%s4558_s7 + $0x50] sm:$0xff] %vm4960_vm0, %v1991_v54  ;;  %v2178_v6 = vadd.f32 %v2177_v58, %v2176_v13 }
 0x54c   :  { %v2179_v16 = vpop.f32.mrf.mxu0 }
 0x54d   :  { %v1994_v42 = vadd.f32 %v2265_v43, %v2178_v6 }
 0x54e   :  { %v2180_v30 = vpop.f32.mrf.mxu0 }
 0x54f   :  { %2024 = vst.msk [vmem:[%s4558_s7 + $0x58] sm:$0xff] %vm4961_vm15, %v1994_v42  ;;  %v2181_v21 = vadd.f32 %v2180_v30, %v2179_v16 }
 0x550   :  { %v2182_v63 = vpop.f32.mrf.mxu0 }
 0x551   :  { %v1999_v7 = vadd.f32 %v2181_v21, %v1998_v56 }
 0x552   :  { %v2183_v37 = vpop.f32.mrf.mxu0 }
 0x553   :  { %2025 = vst.msk [vmem:[%s4558_s7 + $0x60] sm:$0xff] %vm4962_vm12, %v1999_v7  ;;  %v2184_v32 = vadd.f32 %v2183_v37, %v2182_v63 }
 0x554   :  { %v2185_v22 = vpop.f32.mrf.mxu0 }
 0x555   :  { %v2002_v57 = vadd.f32 %v2184_v32, %v2001_v28 }
 0x556   :  { %v2186_v12 = vpop.f32.mrf.mxu0 }
 0x557   :  { %2026 = vst.msk [vmem:[%s4558_s7 + $0x68] sm:$0xff] %vm4963_vm10, %v2002_v57  ;;  %v2187_v52 = vadd.f32 %v2186_v12, %v2185_v22 }
 0x558   :  { %v2188_v62 = vpop.f32.mrf.mxu0 }
 0x559   :  { %v2007_v9 = vadd.f32 %v2268_v35, %v2187_v52 }
 0x55a   :  { %v2189_v20 = vpop.f32.mrf.mxu0 }
 0x55b   :  { %2027 = vst.msk [vmem:[%s4558_s7 + $0x70] sm:$0xff] %vm4964_vm4, %v2007_v9  ;;  %v2190_v59 = vadd.f32 %v2189_v20, %v2188_v62 }
 0x55d   :  { %v2010_v15 = vadd.f32 %v2269_v55, %v2190_v59 }
 0x55f   :  { %2028 = vst.msk [vmem:[%s4558_s7 + $0x78] sm:$0xff] %vm4965_vm3, %v2010_v15 }

</bundles_post_ra>
